<compile_context>
chip_gen: v7x
topology: tpu7x:2x2x1
jax: 0.10.0
libtpu: 0.0.40
codegen_flags: <defaults>
</compile_context>

<pallas_src>
import math

import jax
import jax.numpy as jnp
from jax.experimental import pallas as pl
from jax.experimental.pallas import tpu as pltpu

HIDDEN = 32
N_HEADS = 4
HEAD_DIM = HIDDEN // N_HEADS
EPS = 1e-5
NEG = -10000.0

PACK_LANES = 128  # lane width of the packed parameter buffers

# Dense packed weight buffer (bf16): name -> (row_start, col_start, rows, cols, transposed)
W_LAYOUT = {
    "qkv_w": (0, 0, HIDDEN, 3 * HIDDEN, False),
    "ao_w":  (0, 96, HIDDEN, HIDDEN, False),
    "kv_w":  (32, 0, HIDDEN, 2 * HIDDEN, False),
    "q_w":   (32, 64, HIDDEN, HIDDEN, False),
    "co_w":  (32, 96, HIDDEN, HIDDEN, False),
    "fc1_w": (64, 0, HIDDEN, 4 * HIDDEN, False),
    "fc2_w": (96, 0, HIDDEN, 4 * HIDDEN, True),   # stored transposed: [32, 128]
}
W_ROWS = 128  # 4 row-blocks of 32; bf16 -> 32 KiB total

# Packed bias / layernorm buffer (f32): name -> (row, n_cols)
B_LAYOUT = {
    "ln1_g": (0, HIDDEN), "ln1_b": (1, HIDDEN),
    "qkv_b": (2, 3 * HIDDEN), "ao_b": (3, HIDDEN),
    "ln2_g": (4, HIDDEN), "ln2_b": (5, HIDDEN),
    "q_b": (6, HIDDEN), "kv_b": (7, 2 * HIDDEN), "co_b": (8, HIDDEN),
    "ln3_g": (9, HIDDEN), "ln3_b": (10, HIDDEN),
    "fc1_b": (11, 4 * HIDDEN), "fc2_b": (12, HIDDEN),
}
B_ROWS = 16  # 13 used rows, padded to a multiple of 8


# ----------------------------- kernel-side math -----------------------------
def _w(w_ref, name):
    r0, c0, nr, nc, _ = W_LAYOUT[name]
    # Load the full 128-lane rows (layout-native), then slice the used lanes.
    return w_ref[r0:r0 + nr, :][:, c0:c0 + nc]          # bf16 [nr, nc]


def _b(b_ref, name):
    r, nc = B_LAYOUT[name]
    return b_ref[r:r + 1, :nc]                            # f32 [1, nc] -> row-broadcast


def _layernorm(x, g, b):
    mean = jnp.mean(x, axis=-1, keepdims=True)
    var = jnp.mean(jnp.square(x - mean), axis=-1, keepdims=True)
    return (x - mean) * jax.lax.rsqrt(var + EPS) * g + b


def _gelu(x):
    # Megatron GPT-2 tanh-approximate gelu (tanh goes to the EUP).
    return 0.5 * x * (1.0 + jnp.tanh(0.7978845608028654 * x * (1.0 + 0.044715 * x * x)))


def _dense(x, w_bf16, bias):
    # MXU operands in bf16, f32 accumulation, f32 bias add.
    return jnp.dot(x.astype(jnp.bfloat16), w_bf16,
                   preferred_element_type=jnp.float32) + bias


def _attention_project(q, k, v, bias, w_out, b_out):
    """Multi-head attention with the head concat folded into the output proj.

    q: [b, sq, h] f32; k, v: [b, sk, h] f32; bias: additive mask ([sq, sk] or
    [b, sq, sk]) or None; w_out: [h, h] bf16; b_out: [1, h] f32.
    Returns concat_heads(softmax(q k^T / sqrt(d) + bias) v) @ w_out + b_out
    as a [b*sq, h] f32 slab, accumulated per-head (no concat).
    """
    b, sq, _ = q.shape
    scale = 1.0 / math.sqrt(HEAD_DIM)
    q16 = (q * scale).astype(jnp.bfloat16)
    k16 = k.astype(jnp.bfloat16)
    v16 = v.astype(jnp.bfloat16)
    acc = jnp.zeros((b * sq, HIDDEN), jnp.float32)
    for hd in range(N_HEADS):
        sl = slice(hd * HEAD_DIM, (hd + 1) * HEAD_DIM)
        s = jnp.einsum("bqd,bkd->bqk", q16[..., sl], k16[..., sl],
                       preferred_element_type=jnp.float32)
        if bias is not None:
            s = s + bias                                   # additive-only masking
        s = s - jnp.max(s, axis=-1, keepdims=True)
        p = jnp.exp(s)
        p = p * pl.reciprocal(jnp.sum(p, axis=-1, keepdims=True), approx=True)
        ctx = jnp.einsum("bqk,bkd->bqd", p.astype(jnp.bfloat16), v16[..., sl],
                         preferred_element_type=jnp.float32)     # [b, sq, d]
        acc = acc + jnp.dot(ctx.reshape(b * sq, HEAD_DIM).astype(jnp.bfloat16),
                            w_out[sl, :],                  # sublane-granular 8-row slice
                            preferred_element_type=jnp.float32)
    return acc + b_out


def _make_decoder_kernel(causal_self: bool, has_cross_bias: bool):
    def kernel(*refs):
        it = iter(refs)
        x_ref = next(it)
        enc_ref = next(it)
        sbias_ref = None if causal_self else next(it)
        cbias_ref = next(it) if has_cross_bias else None
        w_ref = next(it)
        b_ref = next(it)
        out_ref = next(it)

        H = HIDDEN
        b, s, _ = x_ref.shape
        _, s_enc, _ = enc_ref.shape

        x = x_ref[...].reshape(b * s, H)                   # sublane-dense [b*s, h] slab
        enc = enc_ref[...].reshape(b * s_enc, H)

        if causal_self:
            # In-kernel causal mask (saves a tiny input DMA).
            rows = jax.lax.broadcasted_iota(jnp.int32, (s, s), 0)
            cols = jax.lax.broadcasted_iota(jnp.int32, (s, s), 1)
            self_bias = jnp.where(rows >= cols, 0.0, NEG)  # [s, s], broadcasts over batch
        else:
            self_bias = sbias_ref[...]
        cross_bias = cbias_ref[...] if has_cross_bias else None

        # --- self attention branch ---
        ln1 = _layernorm(x, _b(b_ref, "ln1_g"), _b(b_ref, "ln1_b"))
        qkv = _dense(ln1, _w(w_ref, "qkv_w"), _b(b_ref, "qkv_b")).reshape(b, s, 3 * H)
        attn_out = _attention_project(qkv[..., :H], qkv[..., H:2 * H], qkv[..., 2 * H:],
                                      self_bias, _w(w_ref, "ao_w"), _b(b_ref, "ao_b"))
        res1 = x + attn_out

        # --- cross attention branch ---
        ln2 = _layernorm(res1, _b(b_ref, "ln2_g"), _b(b_ref, "ln2_b"))
        qc = _dense(ln2, _w(w_ref, "q_w"), _b(b_ref, "q_b")).reshape(b, s, H)
        kv = _dense(enc, _w(w_ref, "kv_w"), _b(b_ref, "kv_b")).reshape(b, s_enc, 2 * H)
        cross_out = _attention_project(qc, kv[..., :H], kv[..., H:],
                                       cross_bias, _w(w_ref, "co_w"), _b(b_ref, "co_b"))
        res2 = res1 + cross_out

        # --- MLP branch ---
        ln3 = _layernorm(res2, _b(b_ref, "ln3_g"), _b(b_ref, "ln3_b"))
        hmid = _gelu(_dense(ln3, _w(w_ref, "fc1_w"), _b(b_ref, "fc1_b")))
        fc2_wt = _w(w_ref, "fc2_w")                        # [32, 128] bf16 (transposed store)
        mlp_out = jax.lax.dot_general(                     # contract on fc2's lane axis (NT)
            hmid.astype(jnp.bfloat16), fc2_wt,
            dimension_numbers=(((1,), (1,)), ((), ())),
            preferred_element_type=jnp.float32) + _b(b_ref, "fc2_b")

        out_ref[...] = (res2 + mlp_out).reshape(b, s, H)   # single wide store

    return kernel


# ----------------------------- host-side wrapper -----------------------------
def pack_params(params):
    """Pack the 14 matrices/biases/LN params into a dense bf16 weight buffer
    (32 KiB) and a small f32 bias buffer (8 KiB)."""
    w_pack = jnp.zeros((W_ROWS, PACK_LANES), jnp.bfloat16)
    for name, (r0, c0, nr, nc, transposed) in W_LAYOUT.items():
        mat = params[name]
        if transposed:
            mat = mat.T
        w_pack = w_pack.at[r0:r0 + nr, c0:c0 + nc].set(mat.astype(jnp.bfloat16))
    b_pack = jnp.zeros((B_ROWS, PACK_LANES), jnp.float32)
    for name, (r, nc) in B_LAYOUT.items():
        b_pack = b_pack.at[r, :nc].set(params[name].reshape(nc).astype(jnp.float32))
    return w_pack, b_pack


@jax.jit
def decoder_layer(hidden_states, encoder_states, w_pack, b_pack,
                  ltor_mask=None, cross_mask=None):
    """ltor_mask=None -> standard causal mask generated in-kernel.
    cross_mask=None  -> unmasked cross attention (bias add elided).
    Provided masks (1 = keep) are converted to additive -1e4 biases host-side."""
    b, s, h = hidden_states.shape
    causal_self = ltor_mask is None
    has_cross_bias = cross_mask is not None

    vmem = pl.BlockSpec(memory_space=pltpu.MemorySpace.VMEM)
    inputs = [hidden_states, encoder_states]
    if not causal_self:
        inputs.append(NEG * (1.0 - ltor_mask.astype(jnp.float32)))
    if has_cross_bias:
        inputs.append(NEG * (1.0 - cross_mask.astype(jnp.float32)))
    inputs += [w_pack, b_pack]

    # No grid: a few KiB of activations + 40 KiB of packed params fit easily
    # in VMEM, so everything is done in one invocation.
    return pl.pallas_call(
        _make_decoder_kernel(causal_self, has_cross_bias),
        out_shape=jax.ShapeDtypeStruct((b, s, h), jnp.float32),
        in_specs=[vmem] * len(inputs),
        out_specs=vmem,
    )(*inputs)


# ----------------------------- reference & setup -----------------------------
def _ref_forward_one(x, enc, lmask, p):
    """Plain-JAX per-example reference mirroring the PyTorch module (f32)."""
    H = HIDDEN

    def ln(z, g, b):
        m = jnp.mean(z, axis=-1, keepdims=True)
        v = jnp.mean((z - m) ** 2, axis=-1, keepdims=True)
        return (z - m) * jax.lax.rsqrt(v + EPS) * g + b

    def mha(q, k, v, mask):
        scale = 1.0 / math.sqrt(HEAD_DIM)
        outs = []
        for hd in range(N_HEADS):
            sl = slice(hd * HEAD_DIM, (hd + 1) * HEAD_DIM)
            s = jnp.dot(q[:, sl], k[:, sl].T) * scale
            if mask is not None:
                s = s * mask - 10000.0 * (1.0 - mask)      # exact Megatron masking
            s = jax.nn.softmax(s, axis=-1)
            outs.append(jnp.dot(s, v[:, sl]))
        return jnp.concatenate(outs, axis=-1)

    ln1 = ln(x, p["ln1_g"], p["ln1_b"])
    qkv = ln1 @ p["qkv_w"] + p["qkv_b"]
    ctx = mha(qkv[:, :H], qkv[:, H:2 * H], qkv[:, 2 * H:], lmask)
    res1 = x + ctx @ p["ao_w"] + p["ao_b"]

    ln2 = ln(res1, p["ln2_g"], p["ln2_b"])
    qc = ln2 @ p["q_w"] + p["q_b"]
    kv = enc @ p["kv_w"] + p["kv_b"]
    ctx_c = mha(qc, kv[:, :H], kv[:, H:], None)            # no cross mask in the demo
    res2 = res1 + ctx_c @ p["co_w"] + p["co_b"]

    ln3 = ln(res2, p["ln3_g"], p["ln3_b"])
    hmid = _gelu(ln3 @ p["fc1_w"] + p["fc1_b"])
    return res2 + hmid @ p["fc2_w"] + p["fc2_b"]


def init_params(key):
    H = HIDDEN

    def w(k, shape):
        # init_method: normal(0, 0.02); biases zero; layernorm gamma=1, beta=0.
        return (0.02 * jax.random.normal(k, shape)).astype(jnp.float32)

    ks = jax.random.split(key, 7)
    return {
        "ln1_g": jnp.ones((1, H), jnp.float32), "ln1_b": jnp.zeros((1, H), jnp.float32),
        "qkv_w": w(ks[0], (H, 3 * H)), "qkv_b": jnp.zeros((1, 3 * H), jnp.float32),
        "ao_w": w(ks[1], (H, H)), "ao_b": jnp.zeros((1, H), jnp.float32),
        "ln2_g": jnp.ones((1, H), jnp.float32), "ln2_b": jnp.zeros((1, H), jnp.float32),
        "q_w": w(ks[2], (H, H)), "q_b": jnp.zeros((1, H), jnp.float32),
        "kv_w": w(ks[3], (H, 2 * H)), "kv_b": jnp.zeros((1, 2 * H), jnp.float32),
        "co_w": w(ks[4], (H, H)), "co_b": jnp.zeros((1, H), jnp.float32),
        "ln3_g": jnp.ones((1, H), jnp.float32), "ln3_b": jnp.zeros((1, H), jnp.float32),
        "fc1_w": w(ks[5], (H, 4 * H)), "fc1_b": jnp.zeros((1, 4 * H), jnp.float32),
        "fc2_w": w(ks[6], (4 * H, H)), "fc2_b": jnp.zeros((1, H), jnp.float32),
    }


if __name__ == "__main__":
    B, S, S_ENC = 2, 8, 8
    key = jax.random.PRNGKey(0)
    kx, kenc, kp = jax.random.split(key, 3)

    x = jax.random.normal(kx, (B, S, HIDDEN), jnp.float32)
    enc = jax.random.normal(kenc, (B, S_ENC, HIDDEN), jnp.float32)
    params = init_params(kp)
    w_pack, b_pack = pack_params(params)

    # Causal self-attn mask generated in-kernel; no cross mask (all-ones elided).
    out = decoder_layer(x, enc, w_pack, b_pack, ltor_mask=None, cross_mask=None)
    jax.block_until_ready(out)

    lmask = jnp.tril(jnp.ones((S, S), jnp.float32))
    ref = jax.vmap(lambda xb, eb: _ref_forward_one(xb, eb, lmask, params))(x, enc)

    assert out.shape == (B, S, HIDDEN)
    max_err = float(jnp.max(jnp.abs(out - ref)))
    assert jnp.allclose(out, ref, atol=1e-2, rtol=1e-2), f"kernel/ref mismatch, max|err|={max_err}"
    print("KERNEL_OK")
</pallas_src>

<mosaic_0001>
module attributes {stable_mosaic.version = 11 : i64} {
  func.func @kernel(%arg0: memref<2x8x32xf32, #tpu.memory_space<vmem>>, %arg1: memref<2x8x32xf32, #tpu.memory_space<vmem>>, %arg2: memref<128x128xbf16, #tpu.memory_space<vmem>>, %arg3: memref<16x128xf32, #tpu.memory_space<vmem>>, %arg4: memref<2x8x32xf32, #tpu.memory_space<vmem>>) attributes {dimension_semantics = [], scalar_prefetch = 0 : i64, scratch_operands = 0 : i64, tpu.core_type = #tpu.core_type<tc>} {
    %c0 = arith.constant 0 : index
    %c0_0 = arith.constant 0 : index
    %c0_1 = arith.constant 0 : index
    %0 = vector.load %arg0[%c0, %c0_0, %c0_1] : memref<2x8x32xf32, #tpu.memory_space<vmem>>, vector<2x8x32xf32>
    %1 = vector.shape_cast %0 : vector<2x8x32xf32> to vector<16x32xf32>
    %c0_2 = arith.constant 0 : index
    %c0_3 = arith.constant 0 : index
    %c0_4 = arith.constant 0 : index
    %2 = vector.load %arg1[%c0_2, %c0_3, %c0_4] : memref<2x8x32xf32, #tpu.memory_space<vmem>>, vector<2x8x32xf32>
    %3 = vector.shape_cast %2 : vector<2x8x32xf32> to vector<16x32xf32>
    %4 = tpu.iota {dimensions = array<i32: 0>} : vector<8x8xi32>
    %5 = tpu.iota {dimensions = array<i32: 1>} : vector<8x8xi32>
    %6 = arith.cmpi sge, %4, %5 : vector<8x8xi32>
    %cst = arith.constant 0.000000e+00 : f32
    %cst_5 = arith.constant -1.000000e+04 : f32
    %7 = vector.broadcast %cst : f32 to vector<8x8xf32>
    %8 = vector.broadcast %cst_5 : f32 to vector<8x8xf32>
    %9 = arith.select %6, %7, %8 : vector<8x8xi1>, vector<8x8xf32>
    %c0_6 = arith.constant 0 : index
    %c0_7 = arith.constant 0 : index
    %10 = vector.load %arg3[%c0_6, %c0_7] : memref<16x128xf32, #tpu.memory_space<vmem>>, vector<1x32xf32>
    %c1 = arith.constant 1 : index
    %c0_8 = arith.constant 0 : index
    %11 = vector.load %arg3[%c1, %c0_8] : memref<16x128xf32, #tpu.memory_space<vmem>>, vector<1x32xf32>
    %cst_9 = arith.constant dense<0.000000e+00> : vector<16xf32>
    %12 = vector.multi_reduction <add>, %1, %cst_9 [1] : vector<16x32xf32> to vector<16xf32>
    %13 = vector.shape_cast %12 : vector<16xf32> to vector<16x1xf32>
    %cst_10 = arith.constant 3.200000e+01 : f32
    %14 = vector.broadcast %cst_10 : f32 to vector<16x1xf32>
    %15 = arith.divf %13, %14 : vector<16x1xf32>
    %16 = vector.broadcast %15 : vector<16x1xf32> to vector<16x32xf32>
    %17 = arith.subf %1, %16 : vector<16x32xf32>
    %18 = arith.mulf %17, %17 : vector<16x32xf32>
    %cst_11 = arith.constant dense<0.000000e+00> : vector<16xf32>
    %19 = vector.multi_reduction <add>, %18, %cst_11 [1] : vector<16x32xf32> to vector<16xf32>
    %20 = vector.shape_cast %19 : vector<16xf32> to vector<16x1xf32>
    %cst_12 = arith.constant 3.200000e+01 : f32
    %21 = vector.broadcast %cst_12 : f32 to vector<16x1xf32>
    %22 = arith.divf %20, %21 : vector<16x1xf32>
    %23 = vector.broadcast %15 : vector<16x1xf32> to vector<16x32xf32>
    %24 = arith.subf %1, %23 : vector<16x32xf32>
    %cst_13 = arith.constant 9.99999974E-6 : f32
    %25 = vector.broadcast %cst_13 : f32 to vector<16x1xf32>
    %26 = arith.addf %22, %25 : vector<16x1xf32>
    %27 = math.rsqrt %26 : vector<16x1xf32>
    %28 = vector.broadcast %27 : vector<16x1xf32> to vector<16x32xf32>
    %29 = arith.mulf %24, %28 : vector<16x32xf32>
    %30 = vector.broadcast %10 : vector<1x32xf32> to vector<16x32xf32>
    %31 = arith.mulf %29, %30 : vector<16x32xf32>
    %32 = vector.broadcast %11 : vector<1x32xf32> to vector<16x32xf32>
    %33 = arith.addf %31, %32 : vector<16x32xf32>
    %c0_14 = arith.constant 0 : index
    %c0_15 = arith.constant 0 : index
    %34 = vector.load %arg2[%c0_14, %c0_15] : memref<128x128xbf16, #tpu.memory_space<vmem>>, vector<32x128xbf16>
    %35 = vector.extract_strided_slice %34 {offsets = [0, 0], sizes = [32, 96], strides = [1, 1]} : vector<32x128xbf16> to vector<32x96xbf16>
    %c2 = arith.constant 2 : index
    %c0_16 = arith.constant 0 : index
    %36 = vector.load %arg3[%c2, %c0_16] : memref<16x128xf32, #tpu.memory_space<vmem>>, vector<1x96xf32>
    %37 = arith.truncf %33 : vector<16x32xf32> to vector<16x32xbf16>
    %cst_17 = arith.constant dense<0.000000e+00> : vector<16x96xf32>
    %38 = tpu.matmul %37, %35, %cst_17 {dimension_numbers = #tpu.dot_dimension_numbers<[1], [0], [0], [1], [0, 0, 1, 1], [], []>} : vector<16x32xbf16>, vector<32x96xbf16>, vector<16x96xf32> -> vector<16x96xf32>
    %39 = vector.broadcast %36 : vector<1x96xf32> to vector<16x96xf32>
    %40 = arith.addf %38, %39 : vector<16x96xf32>
    %41 = vector.shape_cast %40 : vector<16x96xf32> to vector<2x8x96xf32>
    %42 = vector.extract_strided_slice %41 {offsets = [0, 0, 0], sizes = [2, 8, 32], strides = [1, 1, 1]} : vector<2x8x96xf32> to vector<2x8x32xf32>
    %43 = vector.extract_strided_slice %41 {offsets = [0, 0, 32], sizes = [2, 8, 32], strides = [1, 1, 1]} : vector<2x8x96xf32> to vector<2x8x32xf32>
    %44 = vector.extract_strided_slice %41 {offsets = [0, 0, 64], sizes = [2, 8, 32], strides = [1, 1, 1]} : vector<2x8x96xf32> to vector<2x8x32xf32>
    %c0_18 = arith.constant 0 : index
    %c0_19 = arith.constant 0 : index
    %45 = vector.load %arg2[%c0_18, %c0_19] : memref<128x128xbf16, #tpu.memory_space<vmem>>, vector<32x128xbf16>
    %46 = vector.extract_strided_slice %45 {offsets = [0, 96], sizes = [32, 32], strides = [1, 1]} : vector<32x128xbf16> to vector<32x32xbf16>
    %c3 = arith.constant 3 : index
    %c0_20 = arith.constant 0 : index
    %47 = vector.load %arg3[%c3, %c0_20] : memref<16x128xf32, #tpu.memory_space<vmem>>, vector<1x32xf32>
    %cst_21 = arith.constant 0.353553385 : f32
    %48 = vector.broadcast %cst_21 : f32 to vector<2x8x32xf32>
    %49 = arith.mulf %42, %48 : vector<2x8x32xf32>
    %50 = arith.truncf %49 : vector<2x8x32xf32> to vector<2x8x32xbf16>
    %51 = arith.truncf %43 : vector<2x8x32xf32> to vector<2x8x32xbf16>
    %52 = arith.truncf %44 : vector<2x8x32xf32> to vector<2x8x32xbf16>
    %cst_22 = arith.constant 0.000000e+00 : f32
    %53 = vector.broadcast %cst_22 : f32 to vector<16x32xf32>
    %54 = vector.extract_strided_slice %50 {offsets = [0, 0, 0], sizes = [2, 8, 8], strides = [1, 1, 1]} : vector<2x8x32xbf16> to vector<2x8x8xbf16>
    %55 = vector.extract_strided_slice %51 {offsets = [0, 0, 0], sizes = [2, 8, 8], strides = [1, 1, 1]} : vector<2x8x32xbf16> to vector<2x8x8xbf16>
    "tpu.trace_start"() <{level = 10 : i32, message = "bqd,bkd->bqk"}> : () -> ()
    %cst_23 = arith.constant dense<0.000000e+00> : vector<2x8x8xf32>
    %56 = tpu.matmul %54, %55, %cst_23 {dimension_numbers = #tpu.dot_dimension_numbers<[2], [2], [1], [1], [0, 0, 0, 1, 1, 1], [0], [0]>} : vector<2x8x8xbf16>, vector<2x8x8xbf16>, vector<2x8x8xf32> -> vector<2x8x8xf32>
    "tpu.trace_stop"() : () -> ()
    %57 = vector.shape_cast %9 : vector<8x8xf32> to vector<1x8x8xf32>
    %58 = vector.broadcast %57 : vector<1x8x8xf32> to vector<2x8x8xf32>
    %59 = arith.addf %56, %58 : vector<2x8x8xf32>
    %cst_24 = arith.constant dense<0xFF800000> : vector<2x8xf32>
    %60 = vector.multi_reduction <maximumf>, %59, %cst_24 [2] : vector<2x8x8xf32> to vector<2x8xf32>
    %61 = vector.shape_cast %60 : vector<2x8xf32> to vector<2x8x1xf32>
    %62 = vector.broadcast %61 : vector<2x8x1xf32> to vector<2x8x8xf32>
    %63 = arith.subf %59, %62 : vector<2x8x8xf32>
    %64 = math.exp %63 : vector<2x8x8xf32>
    %cst_25 = arith.constant dense<0.000000e+00> : vector<2x8xf32>
    %65 = vector.multi_reduction <add>, %64, %cst_25 [2] : vector<2x8x8xf32> to vector<2x8xf32>
    %66 = vector.shape_cast %65 : vector<2x8xf32> to vector<2x8x1xf32>
    %67 = tpu.reciprocal %66 {approx = true} : vector<2x8x1xf32> -> vector<2x8x1xf32>
    %68 = vector.broadcast %67 : vector<2x8x1xf32> to vector<2x8x8xf32>
    %69 = arith.mulf %64, %68 : vector<2x8x8xf32>
    %70 = arith.truncf %69 : vector<2x8x8xf32> to vector<2x8x8xbf16>
    %71 = vector.extract_strided_slice %52 {offsets = [0, 0, 0], sizes = [2, 8, 8], strides = [1, 1, 1]} : vector<2x8x32xbf16> to vector<2x8x8xbf16>
    "tpu.trace_start"() <{level = 10 : i32, message = "bqk,bkd->bqd"}> : () -> ()
    %cst_26 = arith.constant dense<0.000000e+00> : vector<2x8x8xf32>
    %72 = tpu.matmul %70, %71, %cst_26 {dimension_numbers = #tpu.dot_dimension_numbers<[2], [1], [1], [2], [0, 0, 0, 1, 1, 2], [0], [0]>} : vector<2x8x8xbf16>, vector<2x8x8xbf16>, vector<2x8x8xf32> -> vector<2x8x8xf32>
    "tpu.trace_stop"() : () -> ()
    %73 = vector.shape_cast %72 : vector<2x8x8xf32> to vector<16x8xf32>
    %74 = arith.truncf %73 : vector<16x8xf32> to vector<16x8xbf16>
    %75 = vector.extract_strided_slice %46 {offsets = [0, 0], sizes = [8, 32], strides = [1, 1]} : vector<32x32xbf16> to vector<8x32xbf16>
    %cst_27 = arith.constant dense<0.000000e+00> : vector<16x32xf32>
    %76 = tpu.matmul %74, %75, %cst_27 {dimension_numbers = #tpu.dot_dimension_numbers<[1], [0], [0], [1], [0, 0, 1, 1], [], []>} : vector<16x8xbf16>, vector<8x32xbf16>, vector<16x32xf32> -> vector<16x32xf32>
    %77 = arith.addf %53, %76 : vector<16x32xf32>
    %78 = vector.extract_strided_slice %50 {offsets = [0, 0, 8], sizes = [2, 8, 8], strides = [1, 1, 1]} : vector<2x8x32xbf16> to vector<2x8x8xbf16>
    %79 = vector.extract_strided_slice %51 {offsets = [0, 0, 8], sizes = [2, 8, 8], strides = [1, 1, 1]} : vector<2x8x32xbf16> to vector<2x8x8xbf16>
    "tpu.trace_start"() <{level = 10 : i32, message = "bqd,bkd->bqk"}> : () -> ()
    %cst_28 = arith.constant dense<0.000000e+00> : vector<2x8x8xf32>
    %80 = tpu.matmul %78, %79, %cst_28 {dimension_numbers = #tpu.dot_dimension_numbers<[2], [2], [1], [1], [0, 0, 0, 1, 1, 1], [0], [0]>} : vector<2x8x8xbf16>, vector<2x8x8xbf16>, vector<2x8x8xf32> -> vector<2x8x8xf32>
    "tpu.trace_stop"() : () -> ()
    %81 = vector.shape_cast %9 : vector<8x8xf32> to vector<1x8x8xf32>
    %82 = vector.broadcast %81 : vector<1x8x8xf32> to vector<2x8x8xf32>
    %83 = arith.addf %80, %82 : vector<2x8x8xf32>
    %cst_29 = arith.constant dense<0xFF800000> : vector<2x8xf32>
    %84 = vector.multi_reduction <maximumf>, %83, %cst_29 [2] : vector<2x8x8xf32> to vector<2x8xf32>
    %85 = vector.shape_cast %84 : vector<2x8xf32> to vector<2x8x1xf32>
    %86 = vector.broadcast %85 : vector<2x8x1xf32> to vector<2x8x8xf32>
    %87 = arith.subf %83, %86 : vector<2x8x8xf32>
    %88 = math.exp %87 : vector<2x8x8xf32>
    %cst_30 = arith.constant dense<0.000000e+00> : vector<2x8xf32>
    %89 = vector.multi_reduction <add>, %88, %cst_30 [2] : vector<2x8x8xf32> to vector<2x8xf32>
    %90 = vector.shape_cast %89 : vector<2x8xf32> to vector<2x8x1xf32>
    %91 = tpu.reciprocal %90 {approx = true} : vector<2x8x1xf32> -> vector<2x8x1xf32>
    %92 = vector.broadcast %91 : vector<2x8x1xf32> to vector<2x8x8xf32>
    %93 = arith.mulf %88, %92 : vector<2x8x8xf32>
    %94 = arith.truncf %93 : vector<2x8x8xf32> to vector<2x8x8xbf16>
    %95 = vector.extract_strided_slice %52 {offsets = [0, 0, 8], sizes = [2, 8, 8], strides = [1, 1, 1]} : vector<2x8x32xbf16> to vector<2x8x8xbf16>
    "tpu.trace_start"() <{level = 10 : i32, message = "bqk,bkd->bqd"}> : () -> ()
    %cst_31 = arith.constant dense<0.000000e+00> : vector<2x8x8xf32>
    %96 = tpu.matmul %94, %95, %cst_31 {dimension_numbers = #tpu.dot_dimension_numbers<[2], [1], [1], [2], [0, 0, 0, 1, 1, 2], [0], [0]>} : vector<2x8x8xbf16>, vector<2x8x8xbf16>, vector<2x8x8xf32> -> vector<2x8x8xf32>
    "tpu.trace_stop"() : () -> ()
    %97 = vector.shape_cast %96 : vector<2x8x8xf32> to vector<16x8xf32>
    %98 = arith.truncf %97 : vector<16x8xf32> to vector<16x8xbf16>
    %99 = vector.extract_strided_slice %46 {offsets = [8, 0], sizes = [8, 32], strides = [1, 1]} : vector<32x32xbf16> to vector<8x32xbf16>
    %cst_32 = arith.constant dense<0.000000e+00> : vector<16x32xf32>
    %100 = tpu.matmul %98, %99, %cst_32 {dimension_numbers = #tpu.dot_dimension_numbers<[1], [0], [0], [1], [0, 0, 1, 1], [], []>} : vector<16x8xbf16>, vector<8x32xbf16>, vector<16x32xf32> -> vector<16x32xf32>
    %101 = arith.addf %77, %100 : vector<16x32xf32>
    %102 = vector.extract_strided_slice %50 {offsets = [0, 0, 16], sizes = [2, 8, 8], strides = [1, 1, 1]} : vector<2x8x32xbf16> to vector<2x8x8xbf16>
    %103 = vector.extract_strided_slice %51 {offsets = [0, 0, 16], sizes = [2, 8, 8], strides = [1, 1, 1]} : vector<2x8x32xbf16> to vector<2x8x8xbf16>
    "tpu.trace_start"() <{level = 10 : i32, message = "bqd,bkd->bqk"}> : () -> ()
    %cst_33 = arith.constant dense<0.000000e+00> : vector<2x8x8xf32>
    %104 = tpu.matmul %102, %103, %cst_33 {dimension_numbers = #tpu.dot_dimension_numbers<[2], [2], [1], [1], [0, 0, 0, 1, 1, 1], [0], [0]>} : vector<2x8x8xbf16>, vector<2x8x8xbf16>, vector<2x8x8xf32> -> vector<2x8x8xf32>
    "tpu.trace_stop"() : () -> ()
    %105 = vector.shape_cast %9 : vector<8x8xf32> to vector<1x8x8xf32>
    %106 = vector.broadcast %105 : vector<1x8x8xf32> to vector<2x8x8xf32>
    %107 = arith.addf %104, %106 : vector<2x8x8xf32>
    %cst_34 = arith.constant dense<0xFF800000> : vector<2x8xf32>
    %108 = vector.multi_reduction <maximumf>, %107, %cst_34 [2] : vector<2x8x8xf32> to vector<2x8xf32>
    %109 = vector.shape_cast %108 : vector<2x8xf32> to vector<2x8x1xf32>
    %110 = vector.broadcast %109 : vector<2x8x1xf32> to vector<2x8x8xf32>
    %111 = arith.subf %107, %110 : vector<2x8x8xf32>
    %112 = math.exp %111 : vector<2x8x8xf32>
    %cst_35 = arith.constant dense<0.000000e+00> : vector<2x8xf32>
    %113 = vector.multi_reduction <add>, %112, %cst_35 [2] : vector<2x8x8xf32> to vector<2x8xf32>
    %114 = vector.shape_cast %113 : vector<2x8xf32> to vector<2x8x1xf32>
    %115 = tpu.reciprocal %114 {approx = true} : vector<2x8x1xf32> -> vector<2x8x1xf32>
    %116 = vector.broadcast %115 : vector<2x8x1xf32> to vector<2x8x8xf32>
    %117 = arith.mulf %112, %116 : vector<2x8x8xf32>
    %118 = arith.truncf %117 : vector<2x8x8xf32> to vector<2x8x8xbf16>
    %119 = vector.extract_strided_slice %52 {offsets = [0, 0, 16], sizes = [2, 8, 8], strides = [1, 1, 1]} : vector<2x8x32xbf16> to vector<2x8x8xbf16>
    "tpu.trace_start"() <{level = 10 : i32, message = "bqk,bkd->bqd"}> : () -> ()
    %cst_36 = arith.constant dense<0.000000e+00> : vector<2x8x8xf32>
    %120 = tpu.matmul %118, %119, %cst_36 {dimension_numbers = #tpu.dot_dimension_numbers<[2], [1], [1], [2], [0, 0, 0, 1, 1, 2], [0], [0]>} : vector<2x8x8xbf16>, vector<2x8x8xbf16>, vector<2x8x8xf32> -> vector<2x8x8xf32>
    "tpu.trace_stop"() : () -> ()
    %121 = vector.shape_cast %120 : vector<2x8x8xf32> to vector<16x8xf32>
    %122 = arith.truncf %121 : vector<16x8xf32> to vector<16x8xbf16>
    %123 = vector.extract_strided_slice %46 {offsets = [16, 0], sizes = [8, 32], strides = [1, 1]} : vector<32x32xbf16> to vector<8x32xbf16>
    %cst_37 = arith.constant dense<0.000000e+00> : vector<16x32xf32>
    %124 = tpu.matmul %122, %123, %cst_37 {dimension_numbers = #tpu.dot_dimension_numbers<[1], [0], [0], [1], [0, 0, 1, 1], [], []>} : vector<16x8xbf16>, vector<8x32xbf16>, vector<16x32xf32> -> vector<16x32xf32>
    %125 = arith.addf %101, %124 : vector<16x32xf32>
    %126 = vector.extract_strided_slice %50 {offsets = [0, 0, 24], sizes = [2, 8, 8], strides = [1, 1, 1]} : vector<2x8x32xbf16> to vector<2x8x8xbf16>
    %127 = vector.extract_strided_slice %51 {offsets = [0, 0, 24], sizes = [2, 8, 8], strides = [1, 1, 1]} : vector<2x8x32xbf16> to vector<2x8x8xbf16>
    "tpu.trace_start"() <{level = 10 : i32, message = "bqd,bkd->bqk"}> : () -> ()
    %cst_38 = arith.constant dense<0.000000e+00> : vector<2x8x8xf32>
    %128 = tpu.matmul %126, %127, %cst_38 {dimension_numbers = #tpu.dot_dimension_numbers<[2], [2], [1], [1], [0, 0, 0, 1, 1, 1], [0], [0]>} : vector<2x8x8xbf16>, vector<2x8x8xbf16>, vector<2x8x8xf32> -> vector<2x8x8xf32>
    "tpu.trace_stop"() : () -> ()
    %129 = vector.shape_cast %9 : vector<8x8xf32> to vector<1x8x8xf32>
    %130 = vector.broadcast %129 : vector<1x8x8xf32> to vector<2x8x8xf32>
    %131 = arith.addf %128, %130 : vector<2x8x8xf32>
    %cst_39 = arith.constant dense<0xFF800000> : vector<2x8xf32>
    %132 = vector.multi_reduction <maximumf>, %131, %cst_39 [2] : vector<2x8x8xf32> to vector<2x8xf32>
    %133 = vector.shape_cast %132 : vector<2x8xf32> to vector<2x8x1xf32>
    %134 = vector.broadcast %133 : vector<2x8x1xf32> to vector<2x8x8xf32>
    %135 = arith.subf %131, %134 : vector<2x8x8xf32>
    %136 = math.exp %135 : vector<2x8x8xf32>
    %cst_40 = arith.constant dense<0.000000e+00> : vector<2x8xf32>
    %137 = vector.multi_reduction <add>, %136, %cst_40 [2] : vector<2x8x8xf32> to vector<2x8xf32>
    %138 = vector.shape_cast %137 : vector<2x8xf32> to vector<2x8x1xf32>
    %139 = tpu.reciprocal %138 {approx = true} : vector<2x8x1xf32> -> vector<2x8x1xf32>
    %140 = vector.broadcast %139 : vector<2x8x1xf32> to vector<2x8x8xf32>
    %141 = arith.mulf %136, %140 : vector<2x8x8xf32>
    %142 = arith.truncf %141 : vector<2x8x8xf32> to vector<2x8x8xbf16>
    %143 = vector.extract_strided_slice %52 {offsets = [0, 0, 24], sizes = [2, 8, 8], strides = [1, 1, 1]} : vector<2x8x32xbf16> to vector<2x8x8xbf16>
    "tpu.trace_start"() <{level = 10 : i32, message = "bqk,bkd->bqd"}> : () -> ()
    %cst_41 = arith.constant dense<0.000000e+00> : vector<2x8x8xf32>
    %144 = tpu.matmul %142, %143, %cst_41 {dimension_numbers = #tpu.dot_dimension_numbers<[2], [1], [1], [2], [0, 0, 0, 1, 1, 2], [0], [0]>} : vector<2x8x8xbf16>, vector<2x8x8xbf16>, vector<2x8x8xf32> -> vector<2x8x8xf32>
    "tpu.trace_stop"() : () -> ()
    %145 = vector.shape_cast %144 : vector<2x8x8xf32> to vector<16x8xf32>
    %146 = arith.truncf %145 : vector<16x8xf32> to vector<16x8xbf16>
    %147 = vector.extract_strided_slice %46 {offsets = [24, 0], sizes = [8, 32], strides = [1, 1]} : vector<32x32xbf16> to vector<8x32xbf16>
    %cst_42 = arith.constant dense<0.000000e+00> : vector<16x32xf32>
    %148 = tpu.matmul %146, %147, %cst_42 {dimension_numbers = #tpu.dot_dimension_numbers<[1], [0], [0], [1], [0, 0, 1, 1], [], []>} : vector<16x8xbf16>, vector<8x32xbf16>, vector<16x32xf32> -> vector<16x32xf32>
    %149 = arith.addf %125, %148 : vector<16x32xf32>
    %150 = vector.broadcast %47 : vector<1x32xf32> to vector<16x32xf32>
    %151 = arith.addf %149, %150 : vector<16x32xf32>
    %152 = arith.addf %1, %151 : vector<16x32xf32>
    %c4 = arith.constant 4 : index
    %c0_43 = arith.constant 0 : index
    %153 = vector.load %arg3[%c4, %c0_43] : memref<16x128xf32, #tpu.memory_space<vmem>>, vector<1x32xf32>
    %c5 = arith.constant 5 : index
    %c0_44 = arith.constant 0 : index
    %154 = vector.load %arg3[%c5, %c0_44] : memref<16x128xf32, #tpu.memory_space<vmem>>, vector<1x32xf32>
    %cst_45 = arith.constant dense<0.000000e+00> : vector<16xf32>
    %155 = vector.multi_reduction <add>, %152, %cst_45 [1] : vector<16x32xf32> to vector<16xf32>
    %156 = vector.shape_cast %155 : vector<16xf32> to vector<16x1xf32>
    %cst_46 = arith.constant 3.200000e+01 : f32
    %157 = vector.broadcast %cst_46 : f32 to vector<16x1xf32>
    %158 = arith.divf %156, %157 : vector<16x1xf32>
    %159 = vector.broadcast %158 : vector<16x1xf32> to vector<16x32xf32>
    %160 = arith.subf %152, %159 : vector<16x32xf32>
    %161 = arith.mulf %160, %160 : vector<16x32xf32>
    %cst_47 = arith.constant dense<0.000000e+00> : vector<16xf32>
    %162 = vector.multi_reduction <add>, %161, %cst_47 [1] : vector<16x32xf32> to vector<16xf32>
    %163 = vector.shape_cast %162 : vector<16xf32> to vector<16x1xf32>
    %cst_48 = arith.constant 3.200000e+01 : f32
    %164 = vector.broadcast %cst_48 : f32 to vector<16x1xf32>
    %165 = arith.divf %163, %164 : vector<16x1xf32>
    %166 = vector.broadcast %158 : vector<16x1xf32> to vector<16x32xf32>
    %167 = arith.subf %152, %166 : vector<16x32xf32>
    %cst_49 = arith.constant 9.99999974E-6 : f32
    %168 = vector.broadcast %cst_49 : f32 to vector<16x1xf32>
    %169 = arith.addf %165, %168 : vector<16x1xf32>
    %170 = math.rsqrt %169 : vector<16x1xf32>
    %171 = vector.broadcast %170 : vector<16x1xf32> to vector<16x32xf32>
    %172 = arith.mulf %167, %171 : vector<16x32xf32>
    %173 = vector.broadcast %153 : vector<1x32xf32> to vector<16x32xf32>
    %174 = arith.mulf %172, %173 : vector<16x32xf32>
    %175 = vector.broadcast %154 : vector<1x32xf32> to vector<16x32xf32>
    %176 = arith.addf %174, %175 : vector<16x32xf32>
    %c32 = arith.constant 32 : index
    %c0_50 = arith.constant 0 : index
    %177 = vector.load %arg2[%c32, %c0_50] : memref<128x128xbf16, #tpu.memory_space<vmem>>, vector<32x128xbf16>
    %178 = vector.extract_strided_slice %177 {offsets = [0, 64], sizes = [32, 32], strides = [1, 1]} : vector<32x128xbf16> to vector<32x32xbf16>
    %c6 = arith.constant 6 : index
    %c0_51 = arith.constant 0 : index
    %179 = vector.load %arg3[%c6, %c0_51] : memref<16x128xf32, #tpu.memory_space<vmem>>, vector<1x32xf32>
    %180 = arith.truncf %176 : vector<16x32xf32> to vector<16x32xbf16>
    %cst_52 = arith.constant dense<0.000000e+00> : vector<16x32xf32>
    %181 = tpu.matmul %180, %178, %cst_52 {dimension_numbers = #tpu.dot_dimension_numbers<[1], [0], [0], [1], [0, 0, 1, 1], [], []>} : vector<16x32xbf16>, vector<32x32xbf16>, vector<16x32xf32> -> vector<16x32xf32>
    %182 = vector.broadcast %179 : vector<1x32xf32> to vector<16x32xf32>
    %183 = arith.addf %181, %182 : vector<16x32xf32>
    %184 = vector.shape_cast %183 : vector<16x32xf32> to vector<2x8x32xf32>
    %c32_53 = arith.constant 32 : index
    %c0_54 = arith.constant 0 : index
    %185 = vector.load %arg2[%c32_53, %c0_54] : memref<128x128xbf16, #tpu.memory_space<vmem>>, vector<32x128xbf16>
    %186 = vector.extract_strided_slice %185 {offsets = [0, 0], sizes = [32, 64], strides = [1, 1]} : vector<32x128xbf16> to vector<32x64xbf16>
    %c7 = arith.constant 7 : index
    %c0_55 = arith.constant 0 : index
    %187 = vector.load %arg3[%c7, %c0_55] : memref<16x128xf32, #tpu.memory_space<vmem>>, vector<1x64xf32>
    %188 = arith.truncf %3 : vector<16x32xf32> to vector<16x32xbf16>
    %cst_56 = arith.constant dense<0.000000e+00> : vector<16x64xf32>
    %189 = tpu.matmul %188, %186, %cst_56 {dimension_numbers = #tpu.dot_dimension_numbers<[1], [0], [0], [1], [0, 0, 1, 1], [], []>} : vector<16x32xbf16>, vector<32x64xbf16>, vector<16x64xf32> -> vector<16x64xf32>
    %190 = vector.broadcast %187 : vector<1x64xf32> to vector<16x64xf32>
    %191 = arith.addf %189, %190 : vector<16x64xf32>
    %192 = vector.shape_cast %191 : vector<16x64xf32> to vector<2x8x64xf32>
    %193 = vector.extract_strided_slice %192 {offsets = [0, 0, 0], sizes = [2, 8, 32], strides = [1, 1, 1]} : vector<2x8x64xf32> to vector<2x8x32xf32>
    %194 = vector.extract_strided_slice %192 {offsets = [0, 0, 32], sizes = [2, 8, 32], strides = [1, 1, 1]} : vector<2x8x64xf32> to vector<2x8x32xf32>
    %c32_57 = arith.constant 32 : index
    %c0_58 = arith.constant 0 : index
    %195 = vector.load %arg2[%c32_57, %c0_58] : memref<128x128xbf16, #tpu.memory_space<vmem>>, vector<32x128xbf16>
    %196 = vector.extract_strided_slice %195 {offsets = [0, 96], sizes = [32, 32], strides = [1, 1]} : vector<32x128xbf16> to vector<32x32xbf16>
    %c8 = arith.constant 8 : index
    %c0_59 = arith.constant 0 : index
    %197 = vector.load %arg3[%c8, %c0_59] : memref<16x128xf32, #tpu.memory_space<vmem>>, vector<1x32xf32>
    %cst_60 = arith.constant 0.353553385 : f32
    %198 = vector.broadcast %cst_60 : f32 to vector<2x8x32xf32>
    %199 = arith.mulf %184, %198 : vector<2x8x32xf32>
    %200 = arith.truncf %199 : vector<2x8x32xf32> to vector<2x8x32xbf16>
    %201 = arith.truncf %193 : vector<2x8x32xf32> to vector<2x8x32xbf16>
    %202 = arith.truncf %194 : vector<2x8x32xf32> to vector<2x8x32xbf16>
    %cst_61 = arith.constant 0.000000e+00 : f32
    %203 = vector.broadcast %cst_61 : f32 to vector<16x32xf32>
    %204 = vector.extract_strided_slice %200 {offsets = [0, 0, 0], sizes = [2, 8, 8], strides = [1, 1, 1]} : vector<2x8x32xbf16> to vector<2x8x8xbf16>
    %205 = vector.extract_strided_slice %201 {offsets = [0, 0, 0], sizes = [2, 8, 8], strides = [1, 1, 1]} : vector<2x8x32xbf16> to vector<2x8x8xbf16>
    "tpu.trace_start"() <{level = 10 : i32, message = "bqd,bkd->bqk"}> : () -> ()
    %cst_62 = arith.constant dense<0.000000e+00> : vector<2x8x8xf32>
    %206 = tpu.matmul %204, %205, %cst_62 {dimension_numbers = #tpu.dot_dimension_numbers<[2], [2], [1], [1], [0, 0, 0, 1, 1, 1], [0], [0]>} : vector<2x8x8xbf16>, vector<2x8x8xbf16>, vector<2x8x8xf32> -> vector<2x8x8xf32>
    "tpu.trace_stop"() : () -> ()
    %cst_63 = arith.constant dense<0xFF800000> : vector<2x8xf32>
    %207 = vector.multi_reduction <maximumf>, %206, %cst_63 [2] : vector<2x8x8xf32> to vector<2x8xf32>
    %208 = vector.shape_cast %207 : vector<2x8xf32> to vector<2x8x1xf32>
    %209 = vector.broadcast %208 : vector<2x8x1xf32> to vector<2x8x8xf32>
    %210 = arith.subf %206, %209 : vector<2x8x8xf32>
    %211 = math.exp %210 : vector<2x8x8xf32>
    %cst_64 = arith.constant dense<0.000000e+00> : vector<2x8xf32>
    %212 = vector.multi_reduction <add>, %211, %cst_64 [2] : vector<2x8x8xf32> to vector<2x8xf32>
    %213 = vector.shape_cast %212 : vector<2x8xf32> to vector<2x8x1xf32>
    %214 = tpu.reciprocal %213 {approx = true} : vector<2x8x1xf32> -> vector<2x8x1xf32>
    %215 = vector.broadcast %214 : vector<2x8x1xf32> to vector<2x8x8xf32>
    %216 = arith.mulf %211, %215 : vector<2x8x8xf32>
    %217 = arith.truncf %216 : vector<2x8x8xf32> to vector<2x8x8xbf16>
    %218 = vector.extract_strided_slice %202 {offsets = [0, 0, 0], sizes = [2, 8, 8], strides = [1, 1, 1]} : vector<2x8x32xbf16> to vector<2x8x8xbf16>
    "tpu.trace_start"() <{level = 10 : i32, message = "bqk,bkd->bqd"}> : () -> ()
    %cst_65 = arith.constant dense<0.000000e+00> : vector<2x8x8xf32>
    %219 = tpu.matmul %217, %218, %cst_65 {dimension_numbers = #tpu.dot_dimension_numbers<[2], [1], [1], [2], [0, 0, 0, 1, 1, 2], [0], [0]>} : vector<2x8x8xbf16>, vector<2x8x8xbf16>, vector<2x8x8xf32> -> vector<2x8x8xf32>
    "tpu.trace_stop"() : () -> ()
    %220 = vector.shape_cast %219 : vector<2x8x8xf32> to vector<16x8xf32>
    %221 = arith.truncf %220 : vector<16x8xf32> to vector<16x8xbf16>
    %222 = vector.extract_strided_slice %196 {offsets = [0, 0], sizes = [8, 32], strides = [1, 1]} : vector<32x32xbf16> to vector<8x32xbf16>
    %cst_66 = arith.constant dense<0.000000e+00> : vector<16x32xf32>
    %223 = tpu.matmul %221, %222, %cst_66 {dimension_numbers = #tpu.dot_dimension_numbers<[1], [0], [0], [1], [0, 0, 1, 1], [], []>} : vector<16x8xbf16>, vector<8x32xbf16>, vector<16x32xf32> -> vector<16x32xf32>
    %224 = arith.addf %203, %223 : vector<16x32xf32>
    %225 = vector.extract_strided_slice %200 {offsets = [0, 0, 8], sizes = [2, 8, 8], strides = [1, 1, 1]} : vector<2x8x32xbf16> to vector<2x8x8xbf16>
    %226 = vector.extract_strided_slice %201 {offsets = [0, 0, 8], sizes = [2, 8, 8], strides = [1, 1, 1]} : vector<2x8x32xbf16> to vector<2x8x8xbf16>
    "tpu.trace_start"() <{level = 10 : i32, message = "bqd,bkd->bqk"}> : () -> ()
    %cst_67 = arith.constant dense<0.000000e+00> : vector<2x8x8xf32>
    %227 = tpu.matmul %225, %226, %cst_67 {dimension_numbers = #tpu.dot_dimension_numbers<[2], [2], [1], [1], [0, 0, 0, 1, 1, 1], [0], [0]>} : vector<2x8x8xbf16>, vector<2x8x8xbf16>, vector<2x8x8xf32> -> vector<2x8x8xf32>
    "tpu.trace_stop"() : () -> ()
    %cst_68 = arith.constant dense<0xFF800000> : vector<2x8xf32>
    %228 = vector.multi_reduction <maximumf>, %227, %cst_68 [2] : vector<2x8x8xf32> to vector<2x8xf32>
    %229 = vector.shape_cast %228 : vector<2x8xf32> to vector<2x8x1xf32>
    %230 = vector.broadcast %229 : vector<2x8x1xf32> to vector<2x8x8xf32>
    %231 = arith.subf %227, %230 : vector<2x8x8xf32>
    %232 = math.exp %231 : vector<2x8x8xf32>
    %cst_69 = arith.constant dense<0.000000e+00> : vector<2x8xf32>
    %233 = vector.multi_reduction <add>, %232, %cst_69 [2] : vector<2x8x8xf32> to vector<2x8xf32>
    %234 = vector.shape_cast %233 : vector<2x8xf32> to vector<2x8x1xf32>
    %235 = tpu.reciprocal %234 {approx = true} : vector<2x8x1xf32> -> vector<2x8x1xf32>
    %236 = vector.broadcast %235 : vector<2x8x1xf32> to vector<2x8x8xf32>
    %237 = arith.mulf %232, %236 : vector<2x8x8xf32>
    %238 = arith.truncf %237 : vector<2x8x8xf32> to vector<2x8x8xbf16>
    %239 = vector.extract_strided_slice %202 {offsets = [0, 0, 8], sizes = [2, 8, 8], strides = [1, 1, 1]} : vector<2x8x32xbf16> to vector<2x8x8xbf16>
    "tpu.trace_start"() <{level = 10 : i32, message = "bqk,bkd->bqd"}> : () -> ()
    %cst_70 = arith.constant dense<0.000000e+00> : vector<2x8x8xf32>
    %240 = tpu.matmul %238, %239, %cst_70 {dimension_numbers = #tpu.dot_dimension_numbers<[2], [1], [1], [2], [0, 0, 0, 1, 1, 2], [0], [0]>} : vector<2x8x8xbf16>, vector<2x8x8xbf16>, vector<2x8x8xf32> -> vector<2x8x8xf32>
    "tpu.trace_stop"() : () -> ()
    %241 = vector.shape_cast %240 : vector<2x8x8xf32> to vector<16x8xf32>
    %242 = arith.truncf %241 : vector<16x8xf32> to vector<16x8xbf16>
    %243 = vector.extract_strided_slice %196 {offsets = [8, 0], sizes = [8, 32], strides = [1, 1]} : vector<32x32xbf16> to vector<8x32xbf16>
    %cst_71 = arith.constant dense<0.000000e+00> : vector<16x32xf32>
    %244 = tpu.matmul %242, %243, %cst_71 {dimension_numbers = #tpu.dot_dimension_numbers<[1], [0], [0], [1], [0, 0, 1, 1], [], []>} : vector<16x8xbf16>, vector<8x32xbf16>, vector<16x32xf32> -> vector<16x32xf32>
    %245 = arith.addf %224, %244 : vector<16x32xf32>
    %246 = vector.extract_strided_slice %200 {offsets = [0, 0, 16], sizes = [2, 8, 8], strides = [1, 1, 1]} : vector<2x8x32xbf16> to vector<2x8x8xbf16>
    %247 = vector.extract_strided_slice %201 {offsets = [0, 0, 16], sizes = [2, 8, 8], strides = [1, 1, 1]} : vector<2x8x32xbf16> to vector<2x8x8xbf16>
    "tpu.trace_start"() <{level = 10 : i32, message = "bqd,bkd->bqk"}> : () -> ()
    %cst_72 = arith.constant dense<0.000000e+00> : vector<2x8x8xf32>
    %248 = tpu.matmul %246, %247, %cst_72 {dimension_numbers = #tpu.dot_dimension_numbers<[2], [2], [1], [1], [0, 0, 0, 1, 1, 1], [0], [0]>} : vector<2x8x8xbf16>, vector<2x8x8xbf16>, vector<2x8x8xf32> -> vector<2x8x8xf32>
    "tpu.trace_stop"() : () -> ()
    %cst_73 = arith.constant dense<0xFF800000> : vector<2x8xf32>
    %249 = vector.multi_reduction <maximumf>, %248, %cst_73 [2] : vector<2x8x8xf32> to vector<2x8xf32>
    %250 = vector.shape_cast %249 : vector<2x8xf32> to vector<2x8x1xf32>
    %251 = vector.broadcast %250 : vector<2x8x1xf32> to vector<2x8x8xf32>
    %252 = arith.subf %248, %251 : vector<2x8x8xf32>
    %253 = math.exp %252 : vector<2x8x8xf32>
    %cst_74 = arith.constant dense<0.000000e+00> : vector<2x8xf32>
    %254 = vector.multi_reduction <add>, %253, %cst_74 [2] : vector<2x8x8xf32> to vector<2x8xf32>
    %255 = vector.shape_cast %254 : vector<2x8xf32> to vector<2x8x1xf32>
    %256 = tpu.reciprocal %255 {approx = true} : vector<2x8x1xf32> -> vector<2x8x1xf32>
    %257 = vector.broadcast %256 : vector<2x8x1xf32> to vector<2x8x8xf32>
    %258 = arith.mulf %253, %257 : vector<2x8x8xf32>
    %259 = arith.truncf %258 : vector<2x8x8xf32> to vector<2x8x8xbf16>
    %260 = vector.extract_strided_slice %202 {offsets = [0, 0, 16], sizes = [2, 8, 8], strides = [1, 1, 1]} : vector<2x8x32xbf16> to vector<2x8x8xbf16>
    "tpu.trace_start"() <{level = 10 : i32, message = "bqk,bkd->bqd"}> : () -> ()
    %cst_75 = arith.constant dense<0.000000e+00> : vector<2x8x8xf32>
    %261 = tpu.matmul %259, %260, %cst_75 {dimension_numbers = #tpu.dot_dimension_numbers<[2], [1], [1], [2], [0, 0, 0, 1, 1, 2], [0], [0]>} : vector<2x8x8xbf16>, vector<2x8x8xbf16>, vector<2x8x8xf32> -> vector<2x8x8xf32>
    "tpu.trace_stop"() : () -> ()
    %262 = vector.shape_cast %261 : vector<2x8x8xf32> to vector<16x8xf32>
    %263 = arith.truncf %262 : vector<16x8xf32> to vector<16x8xbf16>
    %264 = vector.extract_strided_slice %196 {offsets = [16, 0], sizes = [8, 32], strides = [1, 1]} : vector<32x32xbf16> to vector<8x32xbf16>
    %cst_76 = arith.constant dense<0.000000e+00> : vector<16x32xf32>
    %265 = tpu.matmul %263, %264, %cst_76 {dimension_numbers = #tpu.dot_dimension_numbers<[1], [0], [0], [1], [0, 0, 1, 1], [], []>} : vector<16x8xbf16>, vector<8x32xbf16>, vector<16x32xf32> -> vector<16x32xf32>
    %266 = arith.addf %245, %265 : vector<16x32xf32>
    %267 = vector.extract_strided_slice %200 {offsets = [0, 0, 24], sizes = [2, 8, 8], strides = [1, 1, 1]} : vector<2x8x32xbf16> to vector<2x8x8xbf16>
    %268 = vector.extract_strided_slice %201 {offsets = [0, 0, 24], sizes = [2, 8, 8], strides = [1, 1, 1]} : vector<2x8x32xbf16> to vector<2x8x8xbf16>
    "tpu.trace_start"() <{level = 10 : i32, message = "bqd,bkd->bqk"}> : () -> ()
    %cst_77 = arith.constant dense<0.000000e+00> : vector<2x8x8xf32>
    %269 = tpu.matmul %267, %268, %cst_77 {dimension_numbers = #tpu.dot_dimension_numbers<[2], [2], [1], [1], [0, 0, 0, 1, 1, 1], [0], [0]>} : vector<2x8x8xbf16>, vector<2x8x8xbf16>, vector<2x8x8xf32> -> vector<2x8x8xf32>
    "tpu.trace_stop"() : () -> ()
    %cst_78 = arith.constant dense<0xFF800000> : vector<2x8xf32>
    %270 = vector.multi_reduction <maximumf>, %269, %cst_78 [2] : vector<2x8x8xf32> to vector<2x8xf32>
    %271 = vector.shape_cast %270 : vector<2x8xf32> to vector<2x8x1xf32>
    %272 = vector.broadcast %271 : vector<2x8x1xf32> to vector<2x8x8xf32>
    %273 = arith.subf %269, %272 : vector<2x8x8xf32>
    %274 = math.exp %273 : vector<2x8x8xf32>
    %cst_79 = arith.constant dense<0.000000e+00> : vector<2x8xf32>
    %275 = vector.multi_reduction <add>, %274, %cst_79 [2] : vector<2x8x8xf32> to vector<2x8xf32>
    %276 = vector.shape_cast %275 : vector<2x8xf32> to vector<2x8x1xf32>
    %277 = tpu.reciprocal %276 {approx = true} : vector<2x8x1xf32> -> vector<2x8x1xf32>
    %278 = vector.broadcast %277 : vector<2x8x1xf32> to vector<2x8x8xf32>
    %279 = arith.mulf %274, %278 : vector<2x8x8xf32>
    %280 = arith.truncf %279 : vector<2x8x8xf32> to vector<2x8x8xbf16>
    %281 = vector.extract_strided_slice %202 {offsets = [0, 0, 24], sizes = [2, 8, 8], strides = [1, 1, 1]} : vector<2x8x32xbf16> to vector<2x8x8xbf16>
    "tpu.trace_start"() <{level = 10 : i32, message = "bqk,bkd->bqd"}> : () -> ()
    %cst_80 = arith.constant dense<0.000000e+00> : vector<2x8x8xf32>
    %282 = tpu.matmul %280, %281, %cst_80 {dimension_numbers = #tpu.dot_dimension_numbers<[2], [1], [1], [2], [0, 0, 0, 1, 1, 2], [0], [0]>} : vector<2x8x8xbf16>, vector<2x8x8xbf16>, vector<2x8x8xf32> -> vector<2x8x8xf32>
    "tpu.trace_stop"() : () -> ()
    %283 = vector.shape_cast %282 : vector<2x8x8xf32> to vector<16x8xf32>
    %284 = arith.truncf %283 : vector<16x8xf32> to vector<16x8xbf16>
    %285 = vector.extract_strided_slice %196 {offsets = [24, 0], sizes = [8, 32], strides = [1, 1]} : vector<32x32xbf16> to vector<8x32xbf16>
    %cst_81 = arith.constant dense<0.000000e+00> : vector<16x32xf32>
    %286 = tpu.matmul %284, %285, %cst_81 {dimension_numbers = #tpu.dot_dimension_numbers<[1], [0], [0], [1], [0, 0, 1, 1], [], []>} : vector<16x8xbf16>, vector<8x32xbf16>, vector<16x32xf32> -> vector<16x32xf32>
    %287 = arith.addf %266, %286 : vector<16x32xf32>
    %288 = vector.broadcast %197 : vector<1x32xf32> to vector<16x32xf32>
    %289 = arith.addf %287, %288 : vector<16x32xf32>
    %290 = arith.addf %152, %289 : vector<16x32xf32>
    %c9 = arith.constant 9 : index
    %c0_82 = arith.constant 0 : index
    %291 = vector.load %arg3[%c9, %c0_82] : memref<16x128xf32, #tpu.memory_space<vmem>>, vector<1x32xf32>
    %c10 = arith.constant 10 : index
    %c0_83 = arith.constant 0 : index
    %292 = vector.load %arg3[%c10, %c0_83] : memref<16x128xf32, #tpu.memory_space<vmem>>, vector<1x32xf32>
    %cst_84 = arith.constant dense<0.000000e+00> : vector<16xf32>
    %293 = vector.multi_reduction <add>, %290, %cst_84 [1] : vector<16x32xf32> to vector<16xf32>
    %294 = vector.shape_cast %293 : vector<16xf32> to vector<16x1xf32>
    %cst_85 = arith.constant 3.200000e+01 : f32
    %295 = vector.broadcast %cst_85 : f32 to vector<16x1xf32>
    %296 = arith.divf %294, %295 : vector<16x1xf32>
    %297 = vector.broadcast %296 : vector<16x1xf32> to vector<16x32xf32>
    %298 = arith.subf %290, %297 : vector<16x32xf32>
    %299 = arith.mulf %298, %298 : vector<16x32xf32>
    %cst_86 = arith.constant dense<0.000000e+00> : vector<16xf32>
    %300 = vector.multi_reduction <add>, %299, %cst_86 [1] : vector<16x32xf32> to vector<16xf32>
    %301 = vector.shape_cast %300 : vector<16xf32> to vector<16x1xf32>
    %cst_87 = arith.constant 3.200000e+01 : f32
    %302 = vector.broadcast %cst_87 : f32 to vector<16x1xf32>
    %303 = arith.divf %301, %302 : vector<16x1xf32>
    %304 = vector.broadcast %296 : vector<16x1xf32> to vector<16x32xf32>
    %305 = arith.subf %290, %304 : vector<16x32xf32>
    %cst_88 = arith.constant 9.99999974E-6 : f32
    %306 = vector.broadcast %cst_88 : f32 to vector<16x1xf32>
    %307 = arith.addf %303, %306 : vector<16x1xf32>
    %308 = math.rsqrt %307 : vector<16x1xf32>
    %309 = vector.broadcast %308 : vector<16x1xf32> to vector<16x32xf32>
    %310 = arith.mulf %305, %309 : vector<16x32xf32>
    %311 = vector.broadcast %291 : vector<1x32xf32> to vector<16x32xf32>
    %312 = arith.mulf %310, %311 : vector<16x32xf32>
    %313 = vector.broadcast %292 : vector<1x32xf32> to vector<16x32xf32>
    %314 = arith.addf %312, %313 : vector<16x32xf32>
    %c64 = arith.constant 64 : index
    %c0_89 = arith.constant 0 : index
    %315 = vector.load %arg2[%c64, %c0_89] : memref<128x128xbf16, #tpu.memory_space<vmem>>, vector<32x128xbf16>
    %c11 = arith.constant 11 : index
    %c0_90 = arith.constant 0 : index
    %316 = vector.load %arg3[%c11, %c0_90] : memref<16x128xf32, #tpu.memory_space<vmem>>, vector<1x128xf32>
    %317 = arith.truncf %314 : vector<16x32xf32> to vector<16x32xbf16>
    %cst_91 = arith.constant dense<0.000000e+00> : vector<16x128xf32>
    %318 = tpu.matmul %317, %315, %cst_91 {dimension_numbers = #tpu.dot_dimension_numbers<[1], [0], [0], [1], [0, 0, 1, 1], [], []>} : vector<16x32xbf16>, vector<32x128xbf16>, vector<16x128xf32> -> vector<16x128xf32>
    %319 = vector.broadcast %316 : vector<1x128xf32> to vector<16x128xf32>
    %320 = arith.addf %318, %319 : vector<16x128xf32>
    %cst_92 = arith.constant 5.000000e-01 : f32
    %321 = vector.broadcast %cst_92 : f32 to vector<16x128xf32>
    %322 = arith.mulf %321, %320 : vector<16x128xf32>
    %cst_93 = arith.constant 0.797884583 : f32
    %323 = vector.broadcast %cst_93 : f32 to vector<16x128xf32>
    %324 = arith.mulf %323, %320 : vector<16x128xf32>
    %cst_94 = arith.constant 4.471500e-02 : f32
    %325 = vector.broadcast %cst_94 : f32 to vector<16x128xf32>
    %326 = arith.mulf %325, %320 : vector<16x128xf32>
    %327 = arith.mulf %326, %320 : vector<16x128xf32>
    %cst_95 = arith.constant 1.000000e+00 : f32
    %328 = vector.broadcast %cst_95 : f32 to vector<16x128xf32>
    %329 = arith.addf %328, %327 : vector<16x128xf32>
    %330 = arith.mulf %324, %329 : vector<16x128xf32>
    %331 = math.tanh %330 : vector<16x128xf32>
    %cst_96 = arith.constant 1.000000e+00 : f32
    %332 = vector.broadcast %cst_96 : f32 to vector<16x128xf32>
    %333 = arith.addf %332, %331 : vector<16x128xf32>
    %334 = arith.mulf %322, %333 : vector<16x128xf32>
    %c96 = arith.constant 96 : index
    %c0_97 = arith.constant 0 : index
    %335 = vector.load %arg2[%c96, %c0_97] : memref<128x128xbf16, #tpu.memory_space<vmem>>, vector<32x128xbf16>
    %336 = arith.truncf %334 : vector<16x128xf32> to vector<16x128xbf16>
    %cst_98 = arith.constant dense<0.000000e+00> : vector<16x32xf32>
    %337 = tpu.matmul %336, %335, %cst_98 {dimension_numbers = #tpu.dot_dimension_numbers<[1], [1], [0], [0], [0, 0, 1, 0], [], []>} : vector<16x128xbf16>, vector<32x128xbf16>, vector<16x32xf32> -> vector<16x32xf32>
    %c12 = arith.constant 12 : index
    %c0_99 = arith.constant 0 : index
    %338 = vector.load %arg3[%c12, %c0_99] : memref<16x128xf32, #tpu.memory_space<vmem>>, vector<1x32xf32>
    %339 = vector.broadcast %338 : vector<1x32xf32> to vector<16x32xf32>
    %340 = arith.addf %337, %339 : vector<16x32xf32>
    %341 = arith.addf %290, %340 : vector<16x32xf32>
    %342 = vector.shape_cast %341 : vector<16x32xf32> to vector<2x8x32xf32>
    %c0_100 = arith.constant 0 : index
    %c0_101 = arith.constant 0 : index
    %c0_102 = arith.constant 0 : index
    %343 = vector.load %arg4[%c0_100, %c0_101, %c0_102] : memref<2x8x32xf32, #tpu.memory_space<vmem>>, vector<2x8x32xf32>
    tpu.vector_store %arg4[%c0_100, %c0_101, %c0_102], %342 {strides = array<i32>} : memref<2x8x32xf32, #tpu.memory_space<vmem>>, vector<2x8x32xf32>,
    return
  }
}

</mosaic_0001>

<bundles_post_ra>
// kernel: decoder_layer.1
= control target key start
LH: loop header
LB: loop body
LE: loop exit
PB: predicated region body
PF: predicated region fallthrough
CT: control target
= control target key end

     0   :  { %9 = vsyncpa [#allocation3], 0  ;;  %s4076_s0 = inlined_call_operand.hbm [shape: f32[2,8,32], index: 0, kind: input, shape index: {}]   ;;  %s4077_s1 = inlined_call_operand.hbm [shape: f32[2,8,32], index: 1, kind: input, shape index: {}]   ;;  %s4078_s2 = inlined_call_operand.hbm [shape: bf16[128,128], index: 2, kind: input, shape index: {}]   ;;  %s4079_s3 = inlined_call_operand.hbm [shape: f32[16,128], index: 3, kind: input, shape index: {}]   ;;  %s4080_s4 = inlined_call_operand.hbm [shape: f32[2,8,32], index: 4, kind: output, shape index: {}]  }
   0x1   :  { %10 = vsyncpa [#allocation6], 0 }
   0x2   :  { %11 = vsyncpa [#allocation9], 0 }
   0x3   :  { %12 = vsyncpa [#allocation4], 0  ;;  %s3453_s15 = smov [#allocation5]   ;;  %s3454_s17 = smov [#allocation2]  }
   0x4   :  { %s30_s16 = sshll.u32 %s3453_s15, 4  ;;  %s18_s18 = sshll.u32 %s3454_s17, 4  ;;  %s31_s16 = int_to_ptr.vmem [resolvable:$true] %s30_s16  ;;  %s3501_s18 = int_to_ptr.vmem [resolvable:$true] %s18_s18 }
   0x5   :  { %s3335_s21 = scalar_lea.hbm %s4077_s1, 256 }
   0x6   :  { %p3336_p0 = scmp.ne.s32.totalorder %s4077_s1, %s3335_s21  ;;  %p3339_p1 = scmp.lt.u32.totalorder %s3335_s21, %s4077_s1 }
   0x8   :  { %p3341_p2 = pnand %p3339_p1, %p3336_p0 }
   0xa   :  { %3344 = shalt.err (!%p3341_p2)
}
   0xb   :  { %s3345_s26 = scalar_lea.vmem %s31_s16, 256  ;;  %p3350_p4 = scmp.lt.s32.totalorder %s31_s16, %s31_s16 }
   0xc   :  { %p3346_p3 = scmp.ne.s32.totalorder %s31_s16, %s3345_s26  ;;  %p3351_p5 = scmp.lt.s32.totalorder %s3345_s26, %s3345_s26 }
   0xe   :  { %p3352_p6 = por %p3351_p5, %p3350_p4 }
  0x10   :  { %p3353_p7 = pnand %p3352_p6, %p3346_p3 }
  0x12   :  { %3356 = shalt.err (!%p3353_p7)
}
  0x13   :  { %s3455_s27 = smov 128   ;;  %s3456_s28 = smov 8  }
  0x14   :  { %36 = dma.hbm_to_vmem [thread:$0]  %s4077_s1, 256, %s31_s16, [#allocation6], %s3455_s27, %s3455_s27, %s3456_s28  }
  0x15   :  { %s3357_s7 = scalar_lea.hbm %s4076_s0, 256 }
  0x16   :  { %p3358_p8 = scmp.ne.s32.totalorder %s4076_s0, %s3357_s7  ;;  %p3361_p9 = scmp.lt.u32.totalorder %s3357_s7, %s4076_s0 }
  0x18   :  { %p3363_p10 = pnand %p3361_p9, %p3358_p8 }
  0x1a   :  { %3366 = shalt.err (!%p3363_p10)
}
  0x1b   :  { %s3367_s12 = scalar_lea.vmem %s3501_s18, 256  ;;  %p3372_p12 = scmp.lt.s32.totalorder %s3501_s18, %s3501_s18 }
  0x1c   :  { %p3368_p11 = scmp.ne.s32.totalorder %s3501_s18, %s3367_s12  ;;  %p3373_p13 = scmp.lt.s32.totalorder %s3367_s12, %s3367_s12 }
  0x1e   :  { %p3374_p0 = por %p3373_p13, %p3372_p12 }
  0x20   :  { %p3375_p1 = pnand %p3374_p0, %p3368_p11 }
  0x22   :  { %3378 = shalt.err (!%p3375_p1)
}
  0x23   :  { %24 = dma.hbm_to_vmem [thread:$0]  %s4076_s0, 256, %s3501_s18, [#allocation3], %s3455_s27, %s3455_s27, %s3456_s28  }
  0x24   :  { %s3457_s14 = smov [#allocation7]   ;;  %s3379_s19 = scalar_lea.hbm %s4078_s2, 1024 }
  0x25   :  { %s42_s15 = sshll.u32 %s3457_s14, 4  ;;  %p3380_p2 = scmp.ne.s32.totalorder %s4078_s2, %s3379_s19  ;;  %s43_s15 = int_to_ptr.vmem [resolvable:$true] %s42_s15 }
  0x26   :  { %p3383_p3 = scmp.lt.u32.totalorder %s3379_s19, %s4078_s2 }
  0x28   :  { %p3385_p4 = pnand %p3383_p3, %p3380_p2 }
  0x2a   :  { %3388 = shalt.err (!%p3385_p4)
}
  0x2b   :  { %s3389_s24 = scalar_lea.vmem %s43_s15, 1024  ;;  %p3394_p6 = scmp.lt.s32.totalorder %s43_s15, %s43_s15 }
  0x2c   :  { %p3390_p5 = scmp.ne.s32.totalorder %s43_s15, %s3389_s24  ;;  %p3395_p7 = scmp.lt.s32.totalorder %s3389_s24, %s3389_s24 }
  0x2e   :  { %p3396_p8 = por %p3395_p7, %p3394_p6 }
  0x30   :  { %p3397_p9 = pnand %p3396_p8, %p3390_p5 }
  0x32   :  { %3400 = shalt.err (!%p3397_p9)
}
  0x33   :  { %s3458_s0 = smov 64   ;;  %s3459_s18 = smov 4  }
  0x34   :  { %48 = dma.hbm_to_vmem [thread:$0]  %s4078_s2, 1024, %s43_s15, [#allocation6], %s3458_s0, %s3458_s0, %s3459_s18  }
  0x35   :  { %s3460_s29 = smov [#allocation8]   ;;  %s3401_s7 = scalar_lea.hbm %s4079_s3, 256 }
  0x36   :  { %s54_s30 = sshll.u32 %s3460_s29, 4  ;;  %p3402_p10 = scmp.ne.s32.totalorder %s4079_s3, %s3401_s7  ;;  %s55_s30 = int_to_ptr.vmem [resolvable:$true] %s54_s30 }
  0x37   :  { %p3405_p11 = scmp.lt.u32.totalorder %s3401_s7, %s4079_s3 }
  0x39   :  { %p3407_p12 = pnand %p3405_p11, %p3402_p10 }
  0x3b   :  { %3410 = shalt.err (!%p3407_p12)
}
  0x3c   :  { %s3411_s12 = scalar_lea.vmem %s55_s30, 256  ;;  %p3416_p0 = scmp.lt.s32.totalorder %s55_s30, %s55_s30 }
  0x3d   :  { %p3412_p13 = scmp.ne.s32.totalorder %s55_s30, %s3411_s12  ;;  %p3417_p1 = scmp.lt.s32.totalorder %s3411_s12, %s3411_s12 }
  0x3f   :  { %p3418_p2 = por %p3417_p1, %p3416_p0 }
  0x41   :  { %p3419_p3 = pnand %p3418_p2, %p3412_p13 }
  0x43   :  { %3422 = shalt.err (!%p3419_p3)
}
  0x44   :  { %60 = dma.hbm_to_vmem [thread:$0]  %s4079_s3, 256, %s55_s30, [#allocation9], %s3455_s27, %s3455_s27, %s3456_s28  }
  0x45   :  { %3445 = dma.done.wait [#allocation3], 256  }
  0x46   :  { %3446 = vsyncadd [#allocation3], 4294967040 }
  0x47   :  { %3447 = dma.done.wait [#allocation6], 1280  }
  0x48   :  { %3448 = vsyncadd [#allocation6], 4294966016 }
  0x49   :  { %3449 = dma.done.wait [#allocation9], 256  }
  0x4a   :  { %3450 = vsyncadd [#allocation9], 4294967040  ;;  %vm86_vm0 = vcmask 261120   ;;  %v3567_v0 = vld [vmem:[#allocation2] sm:$0xff]  ;;  %v3569_v1 = vld [vmem:[#allocation2 + $0x8] sm:$0xff]  ;;  %v3461_v17 = vmov 0.0   ;;  %v78_v55 = vlaneseq }
  0x4b   :  { %v87_v2 = vsel %vm86_vm0, %v3567_v0, 0.0  ;;  %v90_v3 = vsel %vm86_vm0, %v3569_v1, 0.0  ;;  %v3579_v14 = vld [vmem:[#allocation7] sm:$0xf]  ;;  %v3581_v15 = vld [vmem:[#allocation7 + $0x4] sm:$0xf]  ;;  %2936 = vmatprep.subr.bf16.mxu1 %v3461_v17  ;;  %2950 = vmatprep.subr.bf16.mxu0 %v3461_v17 }
  0x4c   :  { %88 = vadd.xlane.f32.xlu0 %v87_v2  ;;  %v2771_v16 = vcombine.low %v3579_v14, %v3581_v15  ;;  %v3586_v18 = vld [vmem:[#allocation7 + $0x8] sm:$0xf]  ;;  %v3588_v19 = vld [vmem:[#allocation7 + $0xc] sm:$0xf]  ;;  %vm3462_vm1 = vmmov 0   ;;  %s3463_s3 = smov 96  }
  0x4d   :  { %v2772_v20 = vcombine.low %v3586_v18, %v3588_v19  ;;  %2940 = vmatprep.mubr.msk.bf16.mxu1 %vm3462_vm1, %v3461_v17  ;;  %2952 = vmatprep.mubr.msk.bf16.mxu0 %vm3462_vm1, %v3461_v17  ;;  %v2768_v29 = vld [vmem:[#allocation8] ss:$0 sm:$0xff]  ;;  %v2769_v33 = vld [vmem:[#allocation8 + $0x1] ss:$0 sm:$0xff]  ;;  %v2770_v38 = vld [vmem:[#allocation8 + $0x2] ss:$0 sm:$0xff] }
  0x4e   :  { %2937 = vmatpush3.bf16.msra.mxu1 %v2771_v16  ;;  %vm202_vm2 = vcmask 64512   ;;  %v79_v56 = vshrl.u32 %v78_v55, 7  ;;  %v81_v57 = vand.u32 127, %v78_v55  ;;  %v3464_v58 = vmov -10000.0   ;;  %s3465_s13 = smov 88   ;;  %s3466_s14 = smov 120  }
  0x4f   :  { %2938 = vmatprep.subr.bf16.mxu1 %v3461_v17  ;;  %vm327_vm4 = vcmask 1043456   ;;  %s3467_s15 = smov 56   ;;  %s3468_s16 = smov 32  }
  0x50   :  { %91 = vadd.xlane.f32.xlu0 %v90_v3  ;;  %vm82_vm3 = vcmp.ge.s32.totalorder %v79_v56, %v81_v57  ;;  %s3469_s17 = smov 80   ;;  %s3470_s19 = smov 112  }
  0x51   :  { %v3626_v59 = vsel %vm82_vm3, 0.0, %v3464_v58  ;;  %s3471_s20 = smov 48   ;;  %s3472_s21 = smov 72  }
  0x52   :  { %2939 = vmatpush3.bf16.msra.mxu1 %v2772_v20  ;;  %s3473_s22 = smov 104   ;;  %s3474_s23 = smov 40  }
  0x53   :  { %2944 = vmatprep.subr.bf16.mxu1 %v3461_v17  ;;  %s3475_s24 = smov [#allocation10]  }
  0xd9   :  { %v89_v4 = vpop.xlane.xlu0 %88 }
  0xda   :  { %v94_v5 = vmul.f32 0.03125, %v89_v4 }
  0xdc   :  { %v96_v6 = vsub.f32 %v3567_v0, %v94_v5 }
  0xdd   :  { %v92_v7 = vpop.xlane.xlu0 %91 }
  0xde   :  { %v95_v8 = vmul.f32 0.03125, %v92_v7  ;;  %v98_v9 = vmul.f32 %v96_v6, %v96_v6 }
  0xe0   :  { %v97_v10 = vsub.f32 %v3569_v1, %v95_v8  ;;  %v100_v11 = vsel %vm86_vm0, %v98_v9, 0.0 }
  0xe1   :  { %101 = vadd.xlane.f32.xlu1 %v100_v11 }
  0xe2   :  { %v99_v12 = vmul.f32 %v97_v10, %v97_v10 }
  0xe4   :  { %v103_v13 = vsel %vm86_vm0, %v99_v12, 0.0 }
  0xe5   :  { %104 = vadd.xlane.f32.xlu1 %v103_v13 }
 0x16e   :  { %v102_v21 = vpop.xlane.xlu1 %101 }
 0x16f   :  { %v106_v22 = vmul.f32 0.03125, %v102_v21 }
 0x171   :  { %v108_v23 = vadd.f32 1e-05, %v106_v22 }
 0x172   :  { %v105_v24 = vpop.xlane.xlu1 %104 }
 0x173   :  { %3255 = vrsqrt.f32 %v108_v23  ;;  %v107_v25 = vmul.f32 0.03125, %v105_v24 }
 0x175   :  { %v109_v26 = vadd.f32 1e-05, %v107_v25 }
 0x177   :  { %3257 = vrsqrt.f32 %v109_v26 }
 0x17d   :  { %v3256_v27 = vpop.eup %3255 }
 0x17e   :  { %v112_v28 = vmul.f32 %v3256_v27, %v96_v6 }
 0x180   :  { %v118_v32 = vmul.f32 %v2768_v29, %v112_v28 }
 0x181   :  { %v3258_v30 = vpop.eup %3257 }
 0x182   :  { %v113_v31 = vmul.f32 %v3258_v30, %v97_v10  ;;  %v124_v35 = vadd.f32 %v2769_v33, %v118_v32 }
 0x184   :  { %v119_v34 = vmul.f32 %v2768_v29, %v113_v31 }
 0x186   :  { %v125_v36 = vadd.f32 %v2769_v33, %v119_v34 }
 0x188   :  { %v131_v37 = vpack.c.bf16 %v125_v36, %v124_v35 }
 0x18a   :  { %2941 = vmatmul.mubr.msk.bf16.vlgmr.msra.gmra.mrb[0].mxu1 %vm86_vm0, %v131_v37 }
 0x18b   :  { %2946 = vmatprep.mubr.msk.bf16.mxu1 %vm3462_vm1, %v3461_v17 }
 0x25d   :  { %v185_v39 = vpop.f32.mrb[0].mxu1 }
 0x25e   :  { %v186_v40 = vadd.f32 %v2770_v38, %v185_v39  ;;  %v2942_v41 = vpop.f32.mrb[1].mxu1 }
 0x25f   :  { %v188_v42 = vpop.f32.mrb[2].mxu1 }
 0x260   :  { %v3602_v43 = vpack.c.bf16 %v186_v40, %v186_v40  ;;  %v189_v44 = vadd.f32 %v2770_v38, %v188_v42  ;;  %v2943_v45 = vpop.f32.mrb[3].mxu1  ;;  %v193_v50 = vmul.f32 0.35355338, %v186_v40 }
 0x262   :  { %v3604_v46 = vpack.c.bf16 %v189_v44, %v189_v44  ;;  %200 = vrot.lane.b32.xlu0 %v3602_v43, %s3463_s3  ;;  %v194_v52 = vmul.f32 0.35355338, %v189_v44  ;;  %v3614_v53 = vpack.c.bf16 %v193_v50, %v193_v50 }
 0x264   :  { %250 = vrot.lane.b32.xlu1 %v3604_v46, %s3463_s3  ;;  %v3616_v54 = vpack.c.bf16 %v194_v52, %v194_v52 }
 0x2d4   :  { %v201_v47 = vpop.permute.xlu0 %200 }
 0x2d5   :  { %v207_v48 = vsel %vm202_vm2, %v201_v47, 0 }
 0x2d6   :  { %2945 = vmatpush3.bf16.xpose.msra.mxu1 %v207_v48  ;;  %v251_v49 = vpop.permute.xlu1 %250 }
 0x2d7   :  { %v256_v51 = vsel %vm202_vm2, %v251_v49, 0  ;;  %2956 = vmatprep.subr.bf16.mxu1 %v3461_v17 }
 0x2d8   :  { %2951 = vmatpush3.bf16.xpose.msra.mxu0 %v256_v51 }
 0x2d9   :  { %2962 = vmatprep.subr.bf16.mxu0 %v3461_v17 }
 0x2dd   :  { %2947 = vmatmul.mubr.msk.bf16.vlgmr.msra.gmra.mrb[4].mxu1 %vm202_vm2, %v3614_v53 }
 0x2de   :  { %2958 = vmatprep.mubr.msk.bf16.mxu1 %vm3462_vm1, %v3461_v17 }
 0x2df   :  { %2953 = vmatmul.mubr.msk.bf16.vlgmr.msra.gmra.mrb[0].mxu0 %vm202_vm2, %v3616_v54 }
 0x2e0   :  { %2964 = vmatprep.mubr.msk.bf16.mxu0 %vm3462_vm1, %v3461_v17 }
 0x3b0   :  { %v243_v60 = vpop.f32.mrb[4].mxu1 }
 0x3b1   :  { %v244_v61 = vadd.f32 %v243_v60, %v3626_v59  ;;  %v2948_v62 = vpop.f32.mrb[5].mxu1 }
 0x3b2   :  { %v246_v63 = vpop.f32.mrb[6].mxu1  ;;  %v292_v2 = vpop.f32.mrb[0].mxu0 }
 0x3b3   :  { %v293_v3 = vadd.f32 %v292_v2, %v3626_v59  ;;  %v2949_v4 = vpop.f32.mrb[7].mxu1  ;;  %v2954_v5 = vpop.f32.mrb[1].mxu0  ;;  %v298_v6 = vsel %vm202_vm2, %v244_v61, -inf }
 0x3b4   :  { %v295_v7 = vpop.f32.mrb[2].mxu0  ;;  %299 = vmax.xlane.f32.xlu1 %v298_v6 }
 0x3b5   :  { %v2955_v8 = vpop.f32.mrb[3].mxu0  ;;  %v301_v9 = vsel %vm202_vm2, %v293_v3, -inf  ;;  %v2782_v7 = vcombine.low %v3581_v15, %v3581_v15 }
 0x3b6   :  { %302 = vmax.xlane.f32.xlu0 %v301_v9  ;;  %v2784_v8 = vcombine.low %v3579_v14, %v3579_v14 }
 0x3c5   :  { %371 = vrot.lane.b32.xlu1 %v3604_v46, %s3458_s0 }
 0x3c9   :  { %423 = vrot.lane.b32.xlu1 %v3602_v43, %s3465_s13 }
 0x441   :  { %v300_v10 = vpop.xlane.xlu1 %299 }
 0x442   :  { %v304_v11 = vsub.f32 %v244_v61, %v300_v10 }
 0x443   :  { %v303_v12 = vpop.xlane.xlu0 %302 }
 0x444   :  { %v306_v13 = vmul.f32 1.442695, %v304_v11  ;;  %v305_v16 = vsub.f32 %v293_v3, %v303_v12 }
 0x445   :  { %v372_v20 = vpop.permute.xlu1 %371 }
 0x446   :  { %3259 = vpow2.f32 %v306_v13  ;;  %v308_v21 = vmul.f32 1.442695, %v305_v16  ;;  %v377_v22 = vsel %vm327_vm4, %v372_v20, 0 }
 0x447   :  { %2963 = vmatpush3.bf16.msra.mxu0 %v377_v22 }
 0x448   :  { %3261 = vpow2.f32 %v308_v21  ;;  %2974 = vmatprep.subr.bf16.mxu0 %v3461_v17 }
 0x449   :  { %v424_v27 = vpop.permute.xlu1 %423 }
 0x44a   :  { %v429_v38 = vsel %vm202_vm2, %v424_v27, 0 }
 0x450   :  { %v3260_v23 = vpop.eup %3259 }
 0x451   :  { %v310_v24 = vsel %vm202_vm2, %v3260_v23, 0.0 }
 0x452   :  { %v3262_v25 = vpop.eup %3261  ;;  %311 = vadd.xlane.f32.xlu0 %v310_v24 }
 0x453   :  { %v313_v26 = vsel %vm202_vm2, %v3262_v25, 0.0 }
 0x454   :  { %314 = vadd.xlane.f32.xlu1 %v313_v26 }
 0x465   :  { %474 = vrot.lane.b32.xlu1 %v3604_v46, %s3465_s13 }
 0x468   :  { %322 = vrot.lane.b32.xlu0 %v3602_v43, %s3458_s0 }
 0x469   :  { %472 = vrot.lane.b32.xlu1 %v3616_v54, %s3466_s14 }
 0x46c   :  { %421 = vrot.lane.b32.xlu0 %v3614_v53, %s3466_s14 }
 0x4df   :  { %v312_v28 = vpop.xlane.xlu0 %311 }
 0x4e0   :  { %3263 = vrcp.f32 %v312_v28 }
 0x4e1   :  { %v315_v29 = vpop.xlane.xlu1 %314 }
 0x4e2   :  { %3265 = vrcp.f32 %v315_v29 }
 0x4e3   :  { %v323_v30 = vpop.permute.xlu0 %322 }
 0x4e4   :  { %v329_v31 = vsel %vm327_vm4, %v323_v30, 0 }
 0x4e5   :  { %2957 = vmatpush3.bf16.msra.mxu1 %v329_v31  ;;  %v475_v37 = vpop.permute.xlu1 %474 }
 0x4e6   :  { %2968 = vmatprep.subr.bf16.mxu1 %v3461_v17  ;;  %v480_v40 = vsel %vm202_vm2, %v475_v37, 0 }
 0x4e7   :  { %v422_v41 = vpop.permute.xlu0 %421 }
 0x4e9   :  { %v473_v42 = vpop.permute.xlu1 %472 }
 0x4ea   :  { %v3264_v32 = vpop.eup %3263 }
 0x4eb   :  { %v318_v33 = vmul.f32 %v3264_v32, %v3260_v23 }
 0x4ec   :  { %v3266_v34 = vpop.eup %3265 }
 0x4ed   :  { %v319_v35 = vmul.f32 %v3266_v34, %v3262_v25  ;;  %v320_v36 = vpack.c.bf16 %v318_v33, %v318_v33 }
 0x4ef   :  { %2959 = vmatmul.mubr.msk.bf16.vlgmr.msra.gmra.mrb[8].mxu1 %vm202_vm2, %v320_v36  ;;  %v321_v39 = vpack.c.bf16 %v319_v35, %v319_v35 }
 0x4f0   :  { %2969 = vmatpush3.bf16.xpose.msra.mxu1 %v429_v38  ;;  %2970 = vmatprep.mubr.msk.bf16.mxu1 %vm3462_vm1, %v3461_v17 }
 0x4f1   :  { %2965 = vmatmul.mubr.msk.bf16.vlgmr.msra.gmra.mrb[4].mxu0 %vm202_vm2, %v321_v39  ;;  %2980 = vmatprep.subr.bf16.mxu1 %v3461_v17 }
 0x4f2   :  { %2975 = vmatpush3.bf16.xpose.msra.mxu0 %v480_v40  ;;  %2976 = vmatprep.mubr.msk.bf16.mxu0 %vm3462_vm1, %v3461_v17 }
 0x4f3   :  { %2986 = vmatprep.subr.bf16.mxu0 %v3461_v17 }
 0x4f7   :  { %2971 = vmatmul.mubr.msk.bf16.vlgmr.msra.gmra.mrb[12].mxu1 %vm202_vm2, %v422_v41 }
 0x4f8   :  { %2982 = vmatprep.mubr.msk.bf16.mxu1 %vm3462_vm1, %v3461_v17 }
 0x4f9   :  { %2977 = vmatmul.mubr.msk.bf16.vlgmr.msra.gmra.mrb[8].mxu0 %vm202_vm2, %v473_v42 }
 0x4fa   :  { %2988 = vmatprep.mubr.msk.bf16.mxu0 %vm3462_vm1, %v3461_v17 }
 0x5c2   :  { %v3666_v44 = vpop.f32.mrb[8].mxu1 }
 0x5c3   :  { %v2960_v45 = vpop.f32.mrb[9].mxu1 }
 0x5c4   :  { %v368_v47 = vpop.f32.mrb[10].mxu1  ;;  %v3668_v48 = vpop.f32.mrb[4].mxu0 }
 0x5c5   :  { %v419_v49 = vpack.c.bf16 %v3668_v48, %v3666_v44  ;;  %v2961_v50 = vpop.f32.mrb[11].mxu1  ;;  %v2966_v51 = vpop.f32.mrb[5].mxu0 }
 0x5c6   :  { %v416_v52 = vpop.f32.mrb[6].mxu0 }
 0x5c7   :  { %v2967_v55 = vpop.f32.mrb[7].mxu0 }
 0x5ca   :  { %v465_v56 = vpop.f32.mrb[12].mxu1 }
 0x5cb   :  { %v466_v57 = vadd.f32 %v465_v56, %v3626_v59  ;;  %v2972_v58 = vpop.f32.mrb[13].mxu1 }
 0x5cc   :  { %v468_v60 = vpop.f32.mrb[14].mxu1  ;;  %v516_v61 = vpop.f32.mrb[8].mxu0 }
 0x5cd   :  { %v517_v62 = vadd.f32 %v516_v61, %v3626_v59  ;;  %v2973_v63 = vpop.f32.mrb[15].mxu1  ;;  %v2978_v2 = vpop.f32.mrb[9].mxu0  ;;  %v522_v3 = vsel %vm202_vm2, %v466_v57, -inf }
 0x5ce   :  { %v519_v4 = vpop.f32.mrb[10].mxu0  ;;  %523 = vmax.xlane.f32.xlu0 %v522_v3 }
 0x5cf   :  { %v2979_v5 = vpop.f32.mrb[11].mxu0  ;;  %v525_v6 = vsel %vm202_vm2, %v517_v62, -inf }
 0x5d0   :  { %526 = vmax.xlane.f32.xlu1 %v525_v6  ;;  %v2790_v6 = vcombine.low %v3586_v18, %v3586_v18 }
 0x5e1   :  { %594 = vrot.lane.b32.xlu1 %v3604_v46, %s3467_s15 }
 0x5e5   :  { %644 = vrot.lane.b32.xlu1 %v2782_v7, %s3468_s16 }
 0x5e9   :  { %694 = vrot.lane.b32.xlu1 %v2784_v8, %s3468_s16 }
 0x5ed   :  { %795 = vrot.lane.b32.xlu1 %v3604_v46, %s3469_s17 }
 0x5f1   :  { %793 = vrot.lane.b32.xlu1 %v3616_v54, %s3470_s19 }
 0x65b   :  { %v524_v15 = vpop.xlane.xlu0 %523 }
 0x65c   :  { %v528_v9 = vsub.f32 %v466_v57, %v524_v15 }
 0x65d   :  { %v527_v10 = vpop.xlane.xlu1 %526 }
 0x65e   :  { %v530_v11 = vmul.f32 1.442695, %v528_v9  ;;  %v529_v12 = vsub.f32 %v517_v62, %v527_v10 }
 0x660   :  { %3267 = vpow2.f32 %v530_v11  ;;  %v532_v14 = vmul.f32 1.442695, %v529_v12 }
 0x661   :  { %v595_v13 = vpop.permute.xlu1 %594 }
 0x662   :  { %3269 = vpow2.f32 %v532_v14  ;;  %v600_v16 = vsel %vm327_vm4, %v595_v13, 0 }
 0x663   :  { %2987 = vmatpush3.bf16.msra.mxu0 %v600_v16 }
 0x664   :  { %2998 = vmatprep.subr.bf16.mxu0 %v3461_v17 }
 0x665   :  { %v645_v29 = vpop.permute.xlu1 %644 }
 0x666   :  { %v650_v31 = vsel %vm327_vm4, %v645_v29, 0 }
 0x669   :  { %v695_v35 = vpop.permute.xlu1 %694 }
 0x66a   :  { %v3268_v20 = vpop.eup %3267  ;;  %v700_v36 = vsel %vm327_vm4, %v695_v35, 0 }
 0x66b   :  { %v534_v21 = vsel %vm202_vm2, %v3268_v20, 0.0 }
 0x66c   :  { %v3270_v22 = vpop.eup %3269  ;;  %535 = vadd.xlane.f32.xlu0 %v534_v21 }
 0x66d   :  { %v537_v23 = vsel %vm202_vm2, %v3270_v22, 0.0  ;;  %v796_v38 = vpop.permute.xlu1 %795 }
 0x66e   :  { %v801_v39 = vsel %vm202_vm2, %v796_v38, 0 }
 0x670   :  { %538 = vadd.xlane.f32.xlu0 %v537_v23 }
 0x671   :  { %v794_v40 = vpop.permute.xlu1 %793 }
 0x686   :  { %546 = vrot.lane.b32.xlu0 %v3602_v43, %s3467_s15 }
 0x68a   :  { %745 = vrot.lane.b32.xlu0 %v3602_v43, %s3469_s17 }
 0x68e   :  { %743 = vrot.lane.b32.xlu0 %v3614_v53, %s3470_s19 }
 0x6f9   :  { %v536_v24 = vpop.xlane.xlu0 %535 }
 0x6fa   :  { %3271 = vrcp.f32 %v536_v24 }
 0x6fd   :  { %v539_v25 = vpop.xlane.xlu0 %538 }
 0x6fe   :  { %3273 = vrcp.f32 %v539_v25 }
 0x701   :  { %v547_v26 = vpop.permute.xlu0 %546 }
 0x702   :  { %v552_v27 = vsel %vm327_vm4, %v547_v26, 0 }
 0x703   :  { %2981 = vmatpush3.bf16.msra.mxu1 %v552_v27 }
 0x704   :  { %v3272_v28 = vpop.eup %3271  ;;  %2992 = vmatprep.subr.bf16.mxu1 %v3461_v17 }
 0x705   :  { %v542_v30 = vmul.f32 %v3272_v28, %v3268_v20  ;;  %v746_v47 = vpop.permute.xlu0 %745 }
 0x706   :  { %v751_v52 = vsel %vm202_vm2, %v746_v47, 0 }
 0x707   :  { %v544_v32 = vpack.c.bf16 %v542_v30, %v542_v30 }
 0x708   :  { %v3274_v33 = vpop.eup %3273 }
 0x709   :  { %v543_v34 = vmul.f32 %v3274_v33, %v3270_v22  ;;  %2983 = vmatmul.mubr.msk.bf16.vlgmr.msra.gmra.mrb[16].mxu1 %vm202_vm2, %v544_v32  ;;  %v744_v58 = vpop.permute.xlu0 %743 }
 0x70a   :  { %2993 = vmatpush3.bf16.msra.mxu1 %v650_v31  ;;  %2994 = vmatprep.mubr.msk.bf16.mxu1 %vm3462_vm1, %v3461_v17 }
 0x70b   :  { %v545_v37 = vpack.c.bf16 %v543_v34, %v543_v34  ;;  %3004 = vmatprep.subr.bf16.mxu1 %v3461_v17 }
 0x70d   :  { %2989 = vmatmul.mubr.msk.bf16.vlgmr.msra.gmra.mrb[12].mxu0 %vm202_vm2, %v545_v37 }
 0x70e   :  { %2999 = vmatpush3.bf16.msra.mxu0 %v700_v36  ;;  %3000 = vmatprep.mubr.msk.bf16.mxu0 %vm3462_vm1, %v3461_v17 }
 0x70f   :  { %3010 = vmatprep.subr.bf16.mxu0 %v3461_v17 }
 0x715   :  { %3001 = vmatmul.mubr.msk.bf16.vlgmr.msra.gmra.mrb[16].mxu0 %vm202_vm2, %v419_v49 }
 0x716   :  { %3012 = vmatprep.mubr.msk.bf16.mxu0 %vm3462_vm1, %v3461_v17 }
 0x717   :  { %3011 = vmatpush3.bf16.xpose.msra.mxu0 %v801_v39 }
 0x718   :  { %3022 = vmatprep.subr.bf16.mxu0 %v3461_v17 }
 0x71e   :  { %3013 = vmatmul.mubr.msk.bf16.vlgmr.msra.gmra.mrb[20].mxu0 %vm202_vm2, %v794_v40 }
 0x71f   :  { %3024 = vmatprep.mubr.msk.bf16.mxu0 %vm3462_vm1, %v3461_v17 }
 0x7dc   :  { %v588_v41 = vpop.f32.mrb[16].mxu1 }
 0x7dd   :  { %v2984_v42 = vpop.f32.mrb[17].mxu1 }
 0x7de   :  { %v591_v45 = vpop.f32.mrb[18].mxu1 }
 0x7df   :  { %v2985_v44 = vpop.f32.mrb[19].mxu1 }
 0x7e0   :  { %v636_v48 = vpop.f32.mrb[12].mxu0 }
 0x7e1   :  { %v642_v49 = vpack.c.bf16 %v636_v48, %v588_v41  ;;  %v2990_v50 = vpop.f32.mrb[13].mxu0 }
 0x7e2   :  { %v639_v51 = vpop.f32.mrb[14].mxu0 }
 0x7e3   :  { %v2991_v55 = vpop.f32.mrb[15].mxu0  ;;  %2995 = vmatmul.mubr.msk.bf16.vlgmr.msra.gmra.mrb[20].mxu1 %vm202_vm2, %v642_v49 }
 0x7e4   :  { %3005 = vmatpush3.bf16.xpose.msra.mxu1 %v751_v52  ;;  %3006 = vmatprep.mubr.msk.bf16.mxu1 %vm3462_vm1, %v3461_v17 }
 0x7e5   :  { %3016 = vmatprep.subr.bf16.mxu1 %v3461_v17 }
 0x7e8   :  { %v736_v56 = vpop.f32.mrb[16].mxu0 }
 0x7e9   :  { %v3002_v57 = vpop.f32.mrb[17].mxu0 }
 0x7ea   :  { %v739_v60 = vpop.f32.mrb[18].mxu0 }
 0x7eb   :  { %v3003_v61 = vpop.f32.mrb[19].mxu0  ;;  %3007 = vmatmul.mubr.msk.bf16.vlgmr.msra.gmra.mrb[24].mxu1 %vm202_vm2, %v744_v58 }
 0x7ec   :  { %3018 = vmatprep.mubr.msk.bf16.mxu1 %vm3462_vm1, %v3461_v17 }
 0x7f1   :  { %v837_v62 = vpop.f32.mrb[20].mxu0 }
 0x7f2   :  { %v838_v63 = vadd.f32 %v837_v62, %v3626_v59  ;;  %v3014_v2 = vpop.f32.mrb[21].mxu0 }
 0x7f3   :  { %v840_v3 = vpop.f32.mrb[22].mxu0 }
 0x7f4   :  { %v3015_v4 = vpop.f32.mrb[23].mxu0  ;;  %v846_v5 = vsel %vm202_vm2, %v838_v63, -inf }
 0x7f5   :  { %847 = vmax.xlane.f32.xlu1 %v846_v5 }
 0x806   :  { %915 = vrot.lane.b32.xlu1 %v3604_v46, %s3471_s20 }
 0x80a   :  { %965 = vrot.lane.b32.xlu1 %v2790_v6, %s3468_s16 }
 0x80e   :  { %1018 = vrot.lane.b32.xlu1 %v3602_v43, %s3472_s21 }
 0x812   :  { %1016 = vrot.lane.b32.xlu1 %v3614_v53, %s3473_s22 }
 0x882   :  { %v848_v7 = vpop.xlane.xlu1 %847 }
 0x883   :  { %v850_v9 = vsub.f32 %v838_v63, %v848_v7 }
 0x885   :  { %v853_v10 = vmul.f32 1.442695, %v850_v9 }
 0x886   :  { %v916_v8 = vpop.permute.xlu1 %915 }
 0x887   :  { %v921_v15 = vsel %vm327_vm4, %v916_v8, 0  ;;  %3275 = vpow2.f32 %v853_v10 }
 0x888   :  { %3023 = vmatpush3.bf16.msra.mxu0 %v921_v15 }
 0x889   :  { %3034 = vmatprep.subr.bf16.mxu0 %v3461_v17 }
 0x88a   :  { %v966_v31 = vpop.permute.xlu1 %965 }
 0x88b   :  { %v971_v47 = vsel %vm327_vm4, %v966_v31, 0 }
 0x88e   :  { %v1019_v36 = vpop.permute.xlu1 %1018 }
 0x88f   :  { %v1024_v38 = vsel %vm202_vm2, %v1019_v36, 0 }
 0x891   :  { %v3276_v25 = vpop.eup %3275 }
 0x892   :  { %v858_v26 = vsel %vm202_vm2, %v3276_v25, 0.0  ;;  %v1017_v39 = vpop.permute.xlu1 %1016 }
 0x8b6   :  { %v686_v18 = vpop.f32.mrb[20].mxu1 }
 0x8b7   :  { %v3740_v11 = vadd.f32 %v736_v56, %v686_v18  ;;  %v2996_v12 = vpop.f32.mrb[21].mxu1 }
 0x8b8   :  { %v689_v14 = vpop.f32.mrb[22].mxu1 }
 0x8b9   :  { %v3742_v13 = vadd.f32 %v739_v60, %v689_v14  ;;  %v2997_v16 = vpop.f32.mrb[23].mxu1 }
 0x8be   :  { %v787_v20 = vpop.f32.mrb[24].mxu1 }
 0x8bf   :  { %v788_v53 = vadd.f32 %v787_v20, %v3626_v59  ;;  %v3008_v21 = vpop.f32.mrb[25].mxu1 }
 0x8c0   :  { %v790_v22 = vpop.f32.mrb[26].mxu1 }
 0x8c1   :  { %v3009_v23 = vpop.f32.mrb[27].mxu1  ;;  %v843_v24 = vsel %vm202_vm2, %v788_v53, -inf }
 0x8c2   :  { %844 = vmax.xlane.f32.xlu0 %v843_v24 }
 0x8c6   :  { %859 = vadd.xlane.f32.xlu0 %v858_v26 }
 0x94f   :  { %v845_v27 = vpop.xlane.xlu0 %844 }
 0x950   :  { %v849_v28 = vsub.f32 %v788_v53, %v845_v27 }
 0x952   :  { %v851_v29 = vmul.f32 1.442695, %v849_v28 }
 0x953   :  { %v860_v30 = vpop.xlane.xlu0 %859 }
 0x954   :  { %3277 = vpow2.f32 %v851_v29 }
 0x955   :  { %3279 = vrcp.f32 %v860_v30 }
 0x95e   :  { %v3278_v32 = vpop.eup %3277 }
 0x95f   :  { %v3280_v33 = vpop.eup %3279  ;;  %v855_v34 = vsel %vm202_vm2, %v3278_v32, 0.0 }
 0x960   :  { %v864_v35 = vmul.f32 %v3280_v33, %v3276_v25  ;;  %856 = vadd.xlane.f32.xlu0 %v855_v34  ;;  %v2796_v34 = vcombine.low %v3588_v19, %v3588_v19 }
 0x962   :  { %v866_v37 = vpack.c.bf16 %v864_v35, %v864_v35 }
 0x964   :  { %3025 = vmatmul.mubr.msk.bf16.vlgmr.msra.gmra.mrb[24].mxu0 %vm202_vm2, %v866_v37 }
 0x965   :  { %3035 = vmatpush3.bf16.xpose.msra.mxu0 %v1024_v38  ;;  %3036 = vmatprep.mubr.msk.bf16.mxu0 %vm3462_vm1, %v3461_v17 }
 0x966   :  { %3046 = vmatprep.subr.bf16.mxu0 %v3461_v17 }
 0x96c   :  { %3037 = vmatmul.mubr.msk.bf16.vlgmr.msra.gmra.mrb[28].mxu0 %vm202_vm2, %v1017_v39 }
 0x96d   :  { %3048 = vmatprep.mubr.msk.bf16.mxu0 %vm3462_vm1, %v3461_v17 }
 0x976   :  { %867 = vrot.lane.b32.xlu0 %v3602_v43, %s3471_s20 }
 0x97a   :  { %1068 = vrot.lane.b32.xlu0 %v3604_v46, %s3472_s21 }
 0x97e   :  { %1066 = vrot.lane.b32.xlu0 %v3616_v54, %s3473_s22 }
 0x9ed   :  { %v857_v40 = vpop.xlane.xlu0 %856 }
 0x9ee   :  { %3281 = vrcp.f32 %v857_v40 }
 0x9f1   :  { %v868_v41 = vpop.permute.xlu0 %867 }
 0x9f2   :  { %v873_v42 = vsel %vm327_vm4, %v868_v41, 0 }
 0x9f3   :  { %3017 = vmatpush3.bf16.msra.mxu1 %v873_v42 }
 0x9f4   :  { %3028 = vmatprep.subr.bf16.mxu1 %v3461_v17 }
 0x9f5   :  { %v1069_v61 = vpop.permute.xlu0 %1068 }
 0x9f6   :  { %v1074_v5 = vsel %vm202_vm2, %v1069_v61, 0 }
 0x9f8   :  { %v3282_v45 = vpop.eup %3281 }
 0x9f9   :  { %v863_v44 = vmul.f32 %v3282_v45, %v3278_v32 }
 0x9fb   :  { %v865_v48 = vpack.c.bf16 %v863_v44, %v863_v44 }
 0x9fd   :  { %3019 = vmatmul.mubr.msk.bf16.vlgmr.msra.gmra.mrb[28].mxu1 %vm202_vm2, %v865_v48 }
 0x9fe   :  { %3029 = vmatpush3.bf16.msra.mxu1 %v971_v47  ;;  %3030 = vmatprep.mubr.msk.bf16.mxu1 %vm3462_vm1, %v3461_v17 }
 0x9ff   :  { %3040 = vmatprep.subr.bf16.mxu1 %v3461_v17 }
 0xa37   :  { %v957_v54 = vpop.f32.mrb[24].mxu0 }
 0xa38   :  { %v3026_v49 = vpop.f32.mrb[25].mxu0 }
 0xa39   :  { %v960_v50 = vpop.f32.mrb[26].mxu0 }
 0xa3a   :  { %v3027_v51 = vpop.f32.mrb[27].mxu0 }
 0xa3b   :  { %v2798_v51 = vld [vmem:[#allocation8 + $0x3] ss:$0 sm:$0xff] }
 0xa3f   :  { %v1060_v52 = vpop.f32.mrb[28].mxu0 }
 0xa40   :  { %v1061_v55 = vadd.f32 %v1060_v52, %v3626_v59  ;;  %v3038_v56 = vpop.f32.mrb[29].mxu0 }
 0xa41   :  { %v1063_v57 = vpop.f32.mrb[30].mxu0 }
 0xa42   :  { %v3039_v58 = vpop.f32.mrb[31].mxu0  ;;  %v1116_v60 = vsel %vm202_vm2, %v1061_v55, -inf }
 0xa43   :  { %1117 = vmax.xlane.f32.xlu1 %v1116_v60 }
 0xa54   :  { %1140 = vrot.lane.b32.xlu1 %v3602_v43, %s3474_s23  ;;  %v1067_v43 = vpop.permute.xlu0 %1066 }
 0xa58   :  { %1238 = vrot.lane.b32.xlu1 %v2796_v34, %s3468_s16 }
 0xad0   :  { %v1118_v62 = vpop.xlane.xlu1 %1117  ;;  %v909_v63 = vpop.f32.mrb[28].mxu1 }
 0xad1   :  { %v963_v2 = vpack.c.bf16 %v957_v54, %v909_v63  ;;  %v3020_v3 = vpop.f32.mrb[29].mxu1  ;;  %v1122_v15 = vsub.f32 %v1061_v55, %v1118_v62 }
 0xad2   :  { %v912_v4 = vpop.f32.mrb[30].mxu1 }
 0xad3   :  { %v3021_v6 = vpop.f32.mrb[31].mxu1  ;;  %3031 = vmatmul.mubr.msk.bf16.vlgmr.msra.gmra.mrb[32].mxu1 %vm202_vm2, %v963_v2  ;;  %v1124_v9 = vmul.f32 1.442695, %v1122_v15 }
 0xad4   :  { %v1141_v7 = vpop.permute.xlu1 %1140  ;;  %3041 = vmatpush3.bf16.xpose.msra.mxu1 %v1074_v5  ;;  %3042 = vmatprep.mubr.msk.bf16.mxu1 %vm3462_vm1, %v3461_v17  ;;  %v3817_v5 = vld [vmem:[#allocation7 + $0x10] sm:$0xf]  ;;  %v3819_v6 = vld [vmem:[#allocation7 + $0x14] sm:$0xf] }
 0xad5   :  { %v1146_v8 = vsel %vm327_vm4, %v1141_v7, 0  ;;  %3052 = vmatprep.subr.bf16.mxu1 %v3461_v17  ;;  %3283 = vpow2.f32 %v1124_v9  ;;  %v3826_v7 = vld [vmem:[#allocation7 + $0x1c] sm:$0xf] }
 0xad6   :  { %3047 = vmatpush3.bf16.msra.mxu0 %v1146_v8 }
 0xad7   :  { %3058 = vmatprep.subr.bf16.mxu0 %v3461_v17 }
 0xadb   :  { %3043 = vmatmul.mubr.msk.bf16.vlgmr.msra.gmra.mrb[36].mxu1 %vm202_vm2, %v1067_v43 }
 0xadc   :  { %3054 = vmatprep.mubr.msk.bf16.mxu1 %vm3462_vm1, %v3461_v17 }
 0xadf   :  { %v3284_v26 = vpop.eup %3283 }
 0xae0   :  { %v1128_v27 = vsel %vm202_vm2, %v3284_v26, 0.0 }
 0xba6   :  { %v1007_v10 = vpop.f32.mrb[32].mxu1 }
 0xba7   :  { %v1014_v18 = vadd.f32 %v1007_v10, %v3740_v11  ;;  %v3032_v12 = vpop.f32.mrb[33].mxu1 }
 0xba8   :  { %v1010_v14 = vpop.f32.mrb[34].mxu1 }
 0xba9   :  { %v1015_v16 = vadd.f32 %v1010_v14, %v3742_v13  ;;  %v3033_v20 = vpop.f32.mrb[35].mxu1 }
 0xbae   :  { %v1110_v53 = vpop.f32.mrb[36].mxu1 }
 0xbaf   :  { %v1111_v21 = vadd.f32 %v1110_v53, %v3626_v59  ;;  %v3044_v22 = vpop.f32.mrb[37].mxu1 }
 0xbb0   :  { %v1113_v23 = vpop.f32.mrb[38].mxu1  ;;  %v77_v22 = vld [vmem:[#allocation5 + $0x8] sm:$0xff] }
 0xbb1   :  { %v3045_v24 = vpop.f32.mrb[39].mxu1  ;;  %v1119_v25 = vsel %vm202_vm2, %v1111_v21, -inf }
 0xbb2   :  { %1120 = vmax.xlane.f32.xlu0 %v1119_v25 }
 0xbb6   :  { %1129 = vadd.xlane.f32.xlu0 %v1128_v27 }
 0xc3f   :  { %v1121_v11 = vpop.xlane.xlu0 %1120 }
 0xc40   :  { %v1123_v28 = vsub.f32 %v1111_v21, %v1121_v11  ;;  %v76_v21 = vld [vmem:[#allocation5] sm:$0xff] }
 0xc41   :  { %v1408_v23 = vpack.c.bf16 %v77_v22, %v76_v21 }
 0xc42   :  { %v1126_v29 = vmul.f32 1.442695, %v1123_v28 }
 0xc43   :  { %v1130_v30 = vpop.xlane.xlu0 %1129 }
 0xc44   :  { %3285 = vpow2.f32 %v1126_v29 }
 0xc45   :  { %3287 = vrcp.f32 %v1130_v30 }
 0xc4e   :  { %v3286_v13 = vpop.eup %3285 }
 0xc4f   :  { %v3288_v31 = vpop.eup %3287  ;;  %v1131_v59 = vsel %vm202_vm2, %v3286_v13, 0.0 }
 0xc50   :  { %v1136_v32 = vmul.f32 %v3288_v31, %v3284_v26  ;;  %1132 = vadd.xlane.f32.xlu0 %v1131_v59  ;;  %v2799_v31 = vld [vmem:[#allocation8 + $0x4] ss:$0 sm:$0xff] }
 0xc52   :  { %v1138_v33 = vpack.c.bf16 %v1136_v32, %v1136_v32 }
 0xc54   :  { %3049 = vmatmul.mubr.msk.bf16.vlgmr.msra.gmra.mrb[32].mxu0 %vm202_vm2, %v1138_v33 }
 0xc55   :  { %3060 = vmatprep.mubr.msk.bf16.mxu0 %vm3462_vm1, %v3461_v17 }
 0xc66   :  { %1188 = vrot.lane.b32.xlu0 %v3604_v46, %s3474_s23  ;;  %v1239_v46 = vpop.permute.xlu1 %1238 }
 0xc67   :  { %v1244_v19 = vsel %vm327_vm4, %v1239_v46, 0 }
 0xc68   :  { %3059 = vmatpush3.bf16.msra.mxu0 %v1244_v19 }
 0xc69   :  { %3072 = vmatprep.subr.bf16.mxu0 %v3461_v17 }
 0xcdd   :  { %v1133_v35 = vpop.xlane.xlu0 %1132 }
 0xcde   :  { %3289 = vrcp.f32 %v1133_v35  ;;  %v2800_v35 = vld [vmem:[#allocation8 + $0x5] ss:$0 sm:$0xff] }
 0xce1   :  { %v1189_v36 = vpop.permute.xlu0 %1188 }
 0xce2   :  { %v1194_v37 = vsel %vm327_vm4, %v1189_v36, 0 }
 0xce3   :  { %3053 = vmatpush3.bf16.msra.mxu1 %v1194_v37 }
 0xce4   :  { %3064 = vmatprep.subr.bf16.mxu1 %v3461_v17 }
 0xce8   :  { %v3290_v38 = vpop.eup %3289 }
 0xce9   :  { %v1137_v39 = vmul.f32 %v3290_v38, %v3286_v13 }
 0xceb   :  { %v1139_v40 = vpack.c.bf16 %v1137_v39, %v1137_v39 }
 0xced   :  { %3055 = vmatmul.mubr.msk.bf16.vlgmr.msra.gmra.mrb[40].mxu1 %vm202_vm2, %v1139_v40  ;;  %v2805_v40 = vld [vmem:[#allocation8 + $0x7] ss:$0 sm:$0xff] }
 0xcee   :  { %3068 = vmatprep.mubr.msk.bf16.mxu1 %vm3462_vm1, %v3461_v17 }
 0xd27   :  { %v1182_v41 = vpop.f32.mrb[32].mxu0 }
 0xd28   :  { %v3050_v42 = vpop.f32.mrb[33].mxu0 }
 0xd29   :  { %v1185_v45 = vpop.f32.mrb[34].mxu0 }
 0xd2a   :  { %v3051_v44 = vpop.f32.mrb[35].mxu0 }
 0xdc0   :  { %v1230_v47 = vpop.f32.mrb[40].mxu1 }
 0xdc1   :  { %v1236_v48 = vpack.c.bf16 %v1230_v47, %v1182_v41  ;;  %v3056_v54 = vpop.f32.mrb[41].mxu1 }
 0xdc2   :  { %v1233_v49 = vpop.f32.mrb[42].mxu1 }
 0xdc3   :  { %v3057_v50 = vpop.f32.mrb[43].mxu1  ;;  %3061 = vmatmul.mubr.msk.bf16.vlgmr.msra.gmra.mrb[36].mxu0 %vm202_vm2, %v1236_v48 }
 0xdc4   :  { %3076 = vmatprep.mubr.msk.bf16.mxu0 %vm3462_vm1, %v3461_v17  ;;  %v2801_v50 = vld [vmem:[#allocation8 + $0x6] ss:$0 sm:$0xff] }
 0xe96   :  { %v1280_v52 = vpop.f32.mrb[36].mxu0 }
 0xe97   :  { %v1287_v55 = vadd.f32 %v1280_v52, %v1014_v18  ;;  %v3062_v56 = vpop.f32.mrb[37].mxu0 }
 0xe98   :  { %v1283_v57 = vpop.f32.mrb[38].mxu0 }
 0xe99   :  { %v1293_v58 = vadd.f32 %v2798_v51, %v1287_v55  ;;  %v1288_v60 = vadd.f32 %v1283_v57, %v1015_v16  ;;  %v3063_v61 = vpop.f32.mrb[39].mxu0 }
 0xe9b   :  { %v3808_v62 = vadd.f32 %v1293_v58, %v3567_v0  ;;  %v1294_v63 = vadd.f32 %v2798_v51, %v1288_v60  ;;  %v2802_v0 = vcombine.low %v3817_v5, %v3819_v6 }
 0xe9d   :  { %v3811_v2 = vadd.f32 %v1294_v63, %v3569_v1  ;;  %v1299_v3 = vsel %vm86_vm0, %v3808_v62, 0.0  ;;  %3073 = vmatpush3.bf16.msra.mxu0 %v2802_v0  ;;  %v3824_v1 = vld [vmem:[#allocation7 + $0x18] sm:$0xf] }
 0xe9e   :  { %1300 = vadd.xlane.f32.xlu1 %v1299_v3  ;;  %3074 = vmatprep.subr.bf16.mxu0 %v3461_v17  ;;  %v2803_v8 = vcombine.low %v3824_v1, %v3826_v7 }
 0xe9f   :  { %v1302_v4 = vsel %vm86_vm0, %v3811_v2, 0.0 }
 0xea0   :  { %1303 = vadd.xlane.f32.xlu0 %v1302_v4 }
 0xea1   :  { %3075 = vmatpush3.bf16.msra.mxu0 %v2803_v8 }
 0xea2   :  { %3086 = vmatprep.subr.bf16.mxu0 %v3461_v17 }
 0xea4   :  { %3077 = vmatmul.mubr.msk.bf16.vlgmr.msra.gmra.mrb[40].mxu0 %vm86_vm0, %v1408_v23 }
 0xea5   :  { %3088 = vmatprep.mubr.msk.bf16.mxu0 %vm3462_vm1, %v3461_v17 }
 0xf2b   :  { %v1301_v43 = vpop.xlane.xlu1 %1300 }
 0xf2c   :  { %v1305_v15 = vmul.f32 0.03125, %v1301_v43 }
 0xf2d   :  { %v1304_v9 = vpop.xlane.xlu0 %1303 }
 0xf2e   :  { %v1307_v10 = vsub.f32 %v3808_v62, %v1305_v15  ;;  %v1306_v18 = vmul.f32 0.03125, %v1304_v9 }
 0xf30   :  { %v1308_v12 = vsub.f32 %v3811_v2, %v1306_v18  ;;  %v1309_v14 = vmul.f32 %v1307_v10, %v1307_v10 }
 0xf32   :  { %v1311_v16 = vsel %vm86_vm0, %v1309_v14, 0.0  ;;  %v1310_v20 = vmul.f32 %v1308_v12, %v1308_v12 }
 0xf33   :  { %1312 = vadd.xlane.f32.xlu0 %v1311_v16 }
 0xf34   :  { %v1314_v53 = vsel %vm86_vm0, %v1310_v20, 0.0 }
 0xf35   :  { %1315 = vadd.xlane.f32.xlu1 %v1314_v53 }
 0xf46   :  { %1359 = vrot.lane.b32.xlu1 %v2803_v8, %s3458_s0 }
 0xf49   :  { %1357 = vrot.lane.b32.xlu0 %v2802_v0, %s3458_s0  ;;  %s2754_s0 = sshll.u32 %s3475_s24, 4  ;;  %s2755_s0 = int_to_ptr.vmem [resolvable:$true] %s2754_s0 }
 0xf4a   :  { %s3423_s18 = scalar_lea.vmem %s2755_s0, 256  ;;  %p3428_p5 = scmp.lt.s32.totalorder %s2755_s0, %s2755_s0 }
 0xf4b   :  { %p3424_p4 = scmp.ne.s32.totalorder %s2755_s0, %s3423_s18  ;;  %p3429_p6 = scmp.lt.s32.totalorder %s3423_s18, %s3423_s18 }
 0xf4d   :  { %p3430_p7 = por %p3429_p6, %p3428_p5 }
 0xf4f   :  { %p3431_p8 = pnand %p3430_p7, %p3424_p4 }
 0xf77   :  { %v1452_v46 = vpop.f32.mrb[40].mxu0 }
 0xf78   :  { %v1453_v19 = vadd.f32 %v2805_v40, %v1452_v46  ;;  %v3078_v41 = vpop.f32.mrb[41].mxu0 }
 0xf79   :  { %v1455_v42 = vpop.f32.mrb[42].mxu0 }
 0xf7a   :  { %v1456_v45 = vadd.f32 %v2805_v40, %v1455_v42  ;;  %v3079_v44 = vpop.f32.mrb[43].mxu0  ;;  %v3845_v47 = vpack.c.bf16 %v1453_v19, %v1453_v19 }
 0xf7c   :  { %v3847_v48 = vpack.c.bf16 %v1456_v45, %v1456_v45  ;;  %v1470_v54 = vsel %vm202_vm2, %v3845_v47, 0 }
 0xf7e   :  { %v1516_v49 = vsel %vm202_vm2, %v3847_v48, 0 }
 0xf7f   :  { %3087 = vmatpush3.bf16.xpose.msra.mxu0 %v1516_v49 }
 0xf80   :  { %3098 = vmatprep.subr.bf16.mxu0 %v3461_v17 }
 0xfc0   :  { %v1313_v24 = vpop.xlane.xlu0 %1312 }
 0xfc1   :  { %v1317_v25 = vmul.f32 0.03125, %v1313_v24 }
 0xfc2   :  { %v1316_v26 = vpop.xlane.xlu1 %1315 }
 0xfc3   :  { %v1319_v27 = vadd.f32 1e-05, %v1317_v25  ;;  %v1318_v11 = vmul.f32 0.03125, %v1316_v26 }
 0xfc4   :  { %v1358_v28 = vpop.permute.xlu0 %1357 }
 0xfc5   :  { %3291 = vrsqrt.f32 %v1319_v27  ;;  %v1320_v29 = vadd.f32 1e-05, %v1318_v11  ;;  %3065 = vmatpush3.bf16.msra.mxu1 %v1358_v28 }
 0xfc6   :  { %v1360_v30 = vpop.permute.xlu1 %1359  ;;  %3066 = vmatprep.subr.bf16.mxu1 %v3461_v17 }
 0xfc7   :  { %3293 = vrsqrt.f32 %v1320_v29 }
 0xfc9   :  { %3067 = vmatpush3.bf16.msra.mxu1 %v1360_v30 }
 0xfca   :  { %3080 = vmatprep.subr.bf16.mxu1 %v3461_v17 }
 0xfcf   :  { %v3292_v13 = vpop.eup %3291 }
 0xfd0   :  { %v1323_v59 = vmul.f32 %v3292_v13, %v1307_v10 }
 0xfd1   :  { %v3294_v32 = vpop.eup %3293 }
 0xfd2   :  { %v1329_v33 = vmul.f32 %v2799_v31, %v1323_v59  ;;  %v1324_v34 = vmul.f32 %v3294_v32, %v1308_v12 }
 0xfd4   :  { %v1330_v36 = vmul.f32 %v2799_v31, %v1324_v34  ;;  %v1335_v37 = vadd.f32 %v2800_v35, %v1329_v33 }
 0xfd6   :  { %v1336_v38 = vadd.f32 %v2800_v35, %v1330_v36 }
 0xfd8   :  { %v1342_v39 = vpack.c.bf16 %v1336_v38, %v1335_v37 }
 0xfda   :  { %3069 = vmatmul.mubr.msk.bf16.vlgmr.msra.gmra.mrb[44].mxu1 %vm86_vm0, %v1342_v39 }
 0xfdb   :  { %3082 = vmatprep.mubr.msk.bf16.mxu1 %vm3462_vm1, %v3461_v17  ;;  %3081 = vmatpush3.bf16.xpose.msra.mxu1 %v1470_v54 }
 0xfdc   :  { %3092 = vmatprep.subr.bf16.mxu1 %v3461_v17 }
0x10ad   :  { %v1400_v51 = vpop.f32.mrb[44].mxu1 }
0x10ae   :  { %v1401_v52 = vadd.f32 %v2801_v50, %v1400_v51  ;;  %v3070_v55 = vpop.f32.mrb[45].mxu1 }
0x10af   :  { %v1403_v56 = vpop.f32.mrb[46].mxu1 }
0x10b0   :  { %v1460_v57 = vmul.f32 0.35355338, %v1401_v52  ;;  %v1404_v58 = vadd.f32 %v2801_v50, %v1403_v56  ;;  %v3071_v60 = vpop.f32.mrb[47].mxu1 }
0x10b2   :  { %v3855_v61 = vpack.c.bf16 %v1460_v57, %v1460_v57  ;;  %v1461_v63 = vmul.f32 0.35355338, %v1404_v58 }
0x10b4   :  { %v3857_v3 = vpack.c.bf16 %v1461_v63, %v1461_v63  ;;  %3083 = vmatmul.mubr.msk.bf16.vlgmr.msra.gmra.mrb[48].mxu1 %vm202_vm2, %v3855_v61 }
0x10b5   :  { %3094 = vmatprep.mubr.msk.bf16.mxu1 %vm3462_vm1, %v3461_v17 }
0x10b6   :  { %3089 = vmatmul.mubr.msk.bf16.vlgmr.msra.gmra.mrb[44].mxu0 %vm202_vm2, %v3857_v3 }
0x10b7   :  { %3100 = vmatprep.mubr.msk.bf16.mxu0 %vm3462_vm1, %v3461_v17 }
0x1187   :  { %v1506_v4 = vpop.f32.mrb[48].mxu1 }
0x1188   :  { %v3084_v0 = vpop.f32.mrb[49].mxu1  ;;  %v1558_v8 = vsel %vm202_vm2, %v1506_v4, -inf }
0x1189   :  { %v1552_v43 = vpop.f32.mrb[44].mxu0  ;;  %1559 = vmax.xlane.f32.xlu1 %v1558_v8  ;;  %v1509_v15 = vpop.f32.mrb[50].mxu1 }
0x118a   :  { %v3085_v9 = vpop.f32.mrb[51].mxu1  ;;  %v3090_v10 = vpop.f32.mrb[45].mxu0  ;;  %v1561_v18 = vsel %vm202_vm2, %v1552_v43, -inf  ;;  %v2815_v15 = vcombine.low %v3819_v6, %v3819_v6 }
0x118b   :  { %1562 = vmax.xlane.f32.xlu0 %v1561_v18  ;;  %v1555_v12 = vpop.f32.mrb[46].mxu0  ;;  %v2817_v9 = vcombine.low %v3817_v5, %v3817_v5 }
0x118c   :  { %v3091_v14 = vpop.f32.mrb[47].mxu0 }
0x119a   :  { %1632 = vrot.lane.b32.xlu1 %v3847_v48, %s3463_s3 }
0x119e   :  { %1684 = vrot.lane.b32.xlu1 %v3845_v47, %s3466_s14 }
0x1216   :  { %v1560_v16 = vpop.xlane.xlu1 %1559 }
0x1217   :  { %v1564_v20 = vsub.f32 %v1506_v4, %v1560_v16 }
0x1218   :  { %v1563_v53 = vpop.xlane.xlu0 %1562 }
0x1219   :  { %v1566_v21 = vmul.f32 1.442695, %v1564_v20  ;;  %v1565_v22 = vsub.f32 %v1552_v43, %v1563_v53 }
0x121a   :  { %v1633_v23 = vpop.permute.xlu1 %1632 }
0x121b   :  { %3295 = vpow2.f32 %v1566_v21  ;;  %v1568_v24 = vmul.f32 1.442695, %v1565_v22  ;;  %v1638_v25 = vsel %vm327_vm4, %v1633_v23, 0 }
0x121c   :  { %3099 = vmatpush3.bf16.msra.mxu0 %v1638_v25 }
0x121d   :  { %3297 = vpow2.f32 %v1568_v24  ;;  %3110 = vmatprep.subr.bf16.mxu0 %v3461_v17 }
0x121e   :  { %v1685_v29 = vpop.permute.xlu1 %1684 }
0x121f   :  { %v1690_v38 = vsel %vm202_vm2, %v1685_v29, 0 }
0x1225   :  { %v3296_v26 = vpop.eup %3295 }
0x1226   :  { %v1570_v27 = vsel %vm202_vm2, %v3296_v26, 0.0 }
0x1227   :  { %v3298_v11 = vpop.eup %3297  ;;  %1571 = vadd.xlane.f32.xlu0 %v1570_v27 }
0x1228   :  { %v1573_v28 = vsel %vm202_vm2, %v3298_v11, 0.0 }
0x1229   :  { %1574 = vadd.xlane.f32.xlu1 %v1573_v28 }
0x123a   :  { %1735 = vrot.lane.b32.xlu1 %v3847_v48, %s3466_s14 }
0x123d   :  { %1583 = vrot.lane.b32.xlu0 %v3845_v47, %s3463_s3 }
0x123e   :  { %1733 = vrot.lane.b32.xlu1 %v3857_v3, %s3466_s14 }
0x1241   :  { %1682 = vrot.lane.b32.xlu0 %v3855_v61, %s3466_s14 }
0x12b4   :  { %v1572_v30 = vpop.xlane.xlu0 %1571 }
0x12b5   :  { %3299 = vrcp.f32 %v1572_v30 }
0x12b6   :  { %v1575_v13 = vpop.xlane.xlu1 %1574 }
0x12b7   :  { %3301 = vrcp.f32 %v1575_v13 }
0x12b8   :  { %v1584_v31 = vpop.permute.xlu0 %1583 }
0x12b9   :  { %v1589_v59 = vsel %vm327_vm4, %v1584_v31, 0 }
0x12ba   :  { %3093 = vmatpush3.bf16.msra.mxu1 %v1589_v59  ;;  %v1736_v37 = vpop.permute.xlu1 %1735 }
0x12bb   :  { %3104 = vmatprep.subr.bf16.mxu1 %v3461_v17  ;;  %v1741_v40 = vsel %vm202_vm2, %v1736_v37, 0 }
0x12bc   :  { %v1683_v46 = vpop.permute.xlu0 %1682 }
0x12be   :  { %v1734_v19 = vpop.permute.xlu1 %1733 }
0x12bf   :  { %v3300_v32 = vpop.eup %3299 }
0x12c0   :  { %v1578_v33 = vmul.f32 %v3300_v32, %v3296_v26 }
0x12c1   :  { %v3302_v34 = vpop.eup %3301 }
0x12c2   :  { %v1579_v35 = vmul.f32 %v3302_v34, %v3298_v11  ;;  %v1580_v36 = vpack.c.bf16 %v1578_v33, %v1578_v33 }
0x12c4   :  { %3095 = vmatmul.mubr.msk.bf16.vlgmr.msra.gmra.mrb[52].mxu1 %vm202_vm2, %v1580_v36  ;;  %v1581_v39 = vpack.c.bf16 %v1579_v35, %v1579_v35 }
0x12c5   :  { %3105 = vmatpush3.bf16.xpose.msra.mxu1 %v1690_v38  ;;  %3106 = vmatprep.mubr.msk.bf16.mxu1 %vm3462_vm1, %v3461_v17 }
0x12c6   :  { %3101 = vmatmul.mubr.msk.bf16.vlgmr.msra.gmra.mrb[48].mxu0 %vm202_vm2, %v1581_v39  ;;  %3116 = vmatprep.subr.bf16.mxu1 %v3461_v17 }
0x12c7   :  { %3111 = vmatpush3.bf16.xpose.msra.mxu0 %v1741_v40  ;;  %3112 = vmatprep.mubr.msk.bf16.mxu0 %vm3462_vm1, %v3461_v17 }
0x12c8   :  { %3122 = vmatprep.subr.bf16.mxu0 %v3461_v17 }
0x12cc   :  { %3107 = vmatmul.mubr.msk.bf16.vlgmr.msra.gmra.mrb[56].mxu1 %vm202_vm2, %v1683_v46 }
0x12cd   :  { %3118 = vmatprep.mubr.msk.bf16.mxu1 %vm3462_vm1, %v3461_v17 }
0x12ce   :  { %3113 = vmatmul.mubr.msk.bf16.vlgmr.msra.gmra.mrb[52].mxu0 %vm202_vm2, %v1734_v19 }
0x12cf   :  { %3124 = vmatprep.mubr.msk.bf16.mxu0 %vm3462_vm1, %v3461_v17 }
0x1397   :  { %v3903_v41 = vpop.f32.mrb[52].mxu1 }
0x1398   :  { %v3096_v42 = vpop.f32.mrb[53].mxu1 }
0x1399   :  { %v1628_v45 = vpop.f32.mrb[54].mxu1  ;;  %v3905_v44 = vpop.f32.mrb[48].mxu0 }
0x139a   :  { %v1680_v54 = vpack.c.bf16 %v3905_v44, %v3903_v41  ;;  %v3097_v49 = vpop.f32.mrb[55].mxu1  ;;  %v3102_v50 = vpop.f32.mrb[49].mxu0 }
0x139b   :  { %v1677_v51 = vpop.f32.mrb[50].mxu0 }
0x139c   :  { %v3103_v52 = vpop.f32.mrb[51].mxu0 }
0x139f   :  { %v1726_v55 = vpop.f32.mrb[56].mxu1 }
0x13a0   :  { %v3108_v56 = vpop.f32.mrb[57].mxu1  ;;  %v1783_v57 = vsel %vm202_vm2, %v1726_v55, -inf }
0x13a1   :  { %v1777_v58 = vpop.f32.mrb[52].mxu0  ;;  %1784 = vmax.xlane.f32.xlu0 %v1783_v57  ;;  %v1729_v60 = vpop.f32.mrb[58].mxu1 }
0x13a2   :  { %v3109_v63 = vpop.f32.mrb[59].mxu1  ;;  %v3114_v4 = vpop.f32.mrb[53].mxu0  ;;  %v1786_v0 = vsel %vm202_vm2, %v1777_v58, -inf }
0x13a3   :  { %1787 = vmax.xlane.f32.xlu1 %v1786_v0  ;;  %v1780_v8 = vpop.f32.mrb[54].mxu0  ;;  %v2823_v0 = vcombine.low %v3824_v1, %v3824_v1 }
0x13a4   :  { %v3115_v43 = vpop.f32.mrb[55].mxu0 }
0x13b4   :  { %1855 = vrot.lane.b32.xlu1 %v3847_v48, %s3465_s13 }
0x13b8   :  { %1905 = vrot.lane.b32.xlu1 %v2815_v15, %s3468_s16 }
0x13bc   :  { %1955 = vrot.lane.b32.xlu1 %v2817_v9, %s3468_s16 }
0x13c0   :  { %2056 = vrot.lane.b32.xlu1 %v3847_v48, %s3470_s19 }
0x13c4   :  { %2054 = vrot.lane.b32.xlu1 %v3857_v3, %s3470_s19 }
0x142e   :  { %v1785_v10 = vpop.xlane.xlu0 %1784 }
0x142f   :  { %v1789_v18 = vsub.f32 %v1726_v55, %v1785_v10 }
0x1430   :  { %v1788_v12 = vpop.xlane.xlu1 %1787 }
0x1431   :  { %v1791_v6 = vmul.f32 1.442695, %v1789_v18  ;;  %v1790_v14 = vsub.f32 %v1777_v58, %v1788_v12 }
0x1433   :  { %3303 = vpow2.f32 %v1791_v6  ;;  %v1793_v16 = vmul.f32 1.442695, %v1790_v14 }
0x1434   :  { %v1856_v20 = vpop.permute.xlu1 %1855 }
0x1435   :  { %3305 = vpow2.f32 %v1793_v16  ;;  %v1861_v5 = vsel %vm327_vm4, %v1856_v20, 0 }
0x1436   :  { %3123 = vmatpush3.bf16.msra.mxu0 %v1861_v5 }
0x1437   :  { %3134 = vmatprep.subr.bf16.mxu0 %v3461_v17 }
0x1438   :  { %v1906_v28 = vpop.permute.xlu1 %1905 }
0x1439   :  { %v1911_v30 = vsel %vm327_vm4, %v1906_v28, 0 }
0x143c   :  { %v1956_v32 = vpop.permute.xlu1 %1955 }
0x143d   :  { %v3304_v53 = vpop.eup %3303  ;;  %v1961_v33 = vsel %vm327_vm4, %v1956_v32, 0 }
0x143e   :  { %v1795_v21 = vsel %vm202_vm2, %v3304_v53, 0.0 }
0x143f   :  { %v3306_v22 = vpop.eup %3305  ;;  %1796 = vadd.xlane.f32.xlu0 %v1795_v21 }
0x1440   :  { %v1798_v23 = vsel %vm202_vm2, %v3306_v22, 0.0  ;;  %v2057_v35 = vpop.permute.xlu1 %2056 }
0x1441   :  { %v2062_v36 = vsel %vm202_vm2, %v2057_v35, 0 }
0x1443   :  { %1799 = vadd.xlane.f32.xlu0 %v1798_v23 }
0x1444   :  { %v2055_v37 = vpop.permute.xlu1 %2054 }
0x1459   :  { %1807 = vrot.lane.b32.xlu0 %v3845_v47, %s3465_s13 }
0x145d   :  { %2006 = vrot.lane.b32.xlu0 %v3845_v47, %s3470_s19 }
0x1461   :  { %2004 = vrot.lane.b32.xlu0 %v3855_v61, %s3470_s19 }
0x14cc   :  { %v1797_v24 = vpop.xlane.xlu0 %1796 }
0x14cd   :  { %3307 = vrcp.f32 %v1797_v24 }
0x14d0   :  { %v1800_v25 = vpop.xlane.xlu0 %1799 }
0x14d1   :  { %3309 = vrcp.f32 %v1800_v25 }
0x14d4   :  { %v1808_v26 = vpop.permute.xlu0 %1807 }
0x14d5   :  { %v1813_v27 = vsel %vm327_vm4, %v1808_v26, 0 }
0x14d6   :  { %3117 = vmatpush3.bf16.msra.mxu1 %v1813_v27 }
0x14d7   :  { %v3308_v11 = vpop.eup %3307  ;;  %3128 = vmatprep.subr.bf16.mxu1 %v3461_v17 }
0x14d8   :  { %v1803_v29 = vmul.f32 %v3308_v11, %v3304_v53  ;;  %v2007_v19 = vpop.permute.xlu0 %2006 }
0x14da   :  { %v1805_v13 = vpack.c.bf16 %v1803_v29, %v1803_v29 }
0x14db   :  { %v3310_v31 = vpop.eup %3309 }
0x14dc   :  { %v1804_v59 = vmul.f32 %v3310_v31, %v3306_v22  ;;  %3119 = vmatmul.mubr.msk.bf16.vlgmr.msra.gmra.mrb[60].mxu1 %vm202_vm2, %v1805_v13  ;;  %v2005_v52 = vpop.permute.xlu0 %2004 }
0x14dd   :  { %3129 = vmatpush3.bf16.msra.mxu1 %v1911_v30  ;;  %3130 = vmatprep.mubr.msk.bf16.mxu1 %vm3462_vm1, %v3461_v17 }
0x14de   :  { %v1806_v34 = vpack.c.bf16 %v1804_v59, %v1804_v59  ;;  %3140 = vmatprep.subr.bf16.mxu1 %v3461_v17 }
0x14e0   :  { %3125 = vmatmul.mubr.msk.bf16.vlgmr.msra.gmra.mrb[56].mxu0 %vm202_vm2, %v1806_v34 }
0x14e1   :  { %3135 = vmatpush3.bf16.msra.mxu0 %v1961_v33  ;;  %3136 = vmatprep.mubr.msk.bf16.mxu0 %vm3462_vm1, %v3461_v17 }
0x14e2   :  { %3146 = vmatprep.subr.bf16.mxu0 %v3461_v17 }
0x14e8   :  { %3137 = vmatmul.mubr.msk.bf16.vlgmr.msra.gmra.mrb[60].mxu0 %vm202_vm2, %v1680_v54  ;;  %v2012_v54 = vsel %vm202_vm2, %v2007_v19, 0 }
0x14e9   :  { %3148 = vmatprep.mubr.msk.bf16.mxu0 %vm3462_vm1, %v3461_v17 }
0x14ea   :  { %3147 = vmatpush3.bf16.xpose.msra.mxu0 %v2062_v36 }
0x14eb   :  { %3158 = vmatprep.subr.bf16.mxu0 %v3461_v17 }
0x14f1   :  { %3149 = vmatmul.mubr.msk.bf16.vlgmr.msra.gmra.mrb[64].mxu0 %vm202_vm2, %v2055_v37 }
0x14f2   :  { %3160 = vmatprep.mubr.msk.bf16.mxu0 %vm3462_vm1, %v3461_v17 }
0x15af   :  { %v1849_v38 = vpop.f32.mrb[60].mxu1 }
0x15b0   :  { %v3120_v39 = vpop.f32.mrb[61].mxu1 }
0x15b1   :  { %v1852_v40 = vpop.f32.mrb[62].mxu1 }
0x15b2   :  { %v3121_v46 = vpop.f32.mrb[63].mxu1 }
0x15b3   :  { %v1897_v41 = vpop.f32.mrb[56].mxu0 }
0x15b4   :  { %v1903_v42 = vpack.c.bf16 %v1897_v41, %v1849_v38  ;;  %v3126_v45 = vpop.f32.mrb[57].mxu0 }
0x15b5   :  { %v1900_v44 = vpop.f32.mrb[58].mxu0 }
0x15b6   :  { %v3127_v49 = vpop.f32.mrb[59].mxu0  ;;  %3131 = vmatmul.mubr.msk.bf16.vlgmr.msra.gmra.mrb[64].mxu1 %vm202_vm2, %v1903_v42 }
0x15b7   :  { %3141 = vmatpush3.bf16.xpose.msra.mxu1 %v2012_v54  ;;  %3142 = vmatprep.mubr.msk.bf16.mxu1 %vm3462_vm1, %v3461_v17 }
0x15b8   :  { %3152 = vmatprep.subr.bf16.mxu1 %v3461_v17 }
0x15bb   :  { %v1997_v50 = vpop.f32.mrb[60].mxu0 }
0x15bc   :  { %v3138_v51 = vpop.f32.mrb[61].mxu0 }
0x15bd   :  { %v2000_v55 = vpop.f32.mrb[62].mxu0 }
0x15be   :  { %v3139_v56 = vpop.f32.mrb[63].mxu0  ;;  %3143 = vmatmul.mubr.msk.bf16.vlgmr.msra.gmra.mrb[68].mxu1 %vm202_vm2, %v2005_v52 }
0x15bf   :  { %3154 = vmatprep.mubr.msk.bf16.mxu1 %vm3462_vm1, %v3461_v17 }
0x15c4   :  { %v2098_v57 = vpop.f32.mrb[64].mxu0 }
0x15c5   :  { %v3150_v58 = vpop.f32.mrb[65].mxu0  ;;  %v2107_v60 = vsel %vm202_vm2, %v2098_v57, -inf }
0x15c6   :  { %2108 = vmax.xlane.f32.xlu1 %v2107_v60  ;;  %v2101_v63 = vpop.f32.mrb[66].mxu0 }
0x15c7   :  { %v3151_v4 = vpop.f32.mrb[67].mxu0 }
0x15d7   :  { %2176 = vrot.lane.b32.xlu1 %v3847_v48, %s3469_s17 }
0x15db   :  { %2226 = vrot.lane.b32.xlu1 %v2823_v0, %s3468_s16 }
0x15df   :  { %2279 = vrot.lane.b32.xlu1 %v3845_v47, %s3473_s22 }
0x15e3   :  { %2277 = vrot.lane.b32.xlu1 %v3855_v61, %s3473_s22 }
0x1653   :  { %v2109_v8 = vpop.xlane.xlu1 %2108 }
0x1654   :  { %v2111_v9 = vsub.f32 %v2098_v57, %v2109_v8 }
0x1656   :  { %v2114_v1 = vmul.f32 1.442695, %v2111_v9 }
0x1657   :  { %v2177_v43 = vpop.permute.xlu1 %2176 }
0x1658   :  { %v2182_v15 = vsel %vm327_vm4, %v2177_v43, 0  ;;  %3311 = vpow2.f32 %v2114_v1 }
0x1659   :  { %3159 = vmatpush3.bf16.msra.mxu0 %v2182_v15 }
0x165a   :  { %3170 = vmatprep.subr.bf16.mxu0 %v3461_v17 }
0x165b   :  { %v2227_v11 = vpop.permute.xlu1 %2226 }
0x165c   :  { %v2232_v39 = vsel %vm327_vm4, %v2227_v11, 0 }
0x165f   :  { %v2280_v31 = vpop.permute.xlu1 %2279 }
0x1660   :  { %v2285_v32 = vsel %vm202_vm2, %v2280_v31, 0 }
0x1662   :  { %v3312_v53 = vpop.eup %3311 }
0x1663   :  { %v2119_v23 = vsel %vm202_vm2, %v3312_v53, 0.0  ;;  %v2278_v33 = vpop.permute.xlu1 %2277 }
0x1689   :  { %v1947_v10 = vpop.f32.mrb[64].mxu1 }
0x168a   :  { %v3976_v18 = vadd.f32 %v1997_v50, %v1947_v10  ;;  %v3132_v12 = vpop.f32.mrb[65].mxu1  ;;  %v2829_v50 = vcombine.low %v3826_v7, %v3826_v7 }
0x168b   :  { %v1950_v6 = vpop.f32.mrb[66].mxu1 }
0x168c   :  { %v3978_v14 = vadd.f32 %v2000_v55, %v1950_v6  ;;  %v3133_v16 = vpop.f32.mrb[67].mxu1 }
0x1691   :  { %v2048_v20 = vpop.f32.mrb[68].mxu1 }
0x1692   :  { %v3144_v61 = vpop.f32.mrb[69].mxu1  ;;  %v2104_v5 = vsel %vm202_vm2, %v2048_v20, -inf }
0x1693   :  { %2105 = vmax.xlane.f32.xlu0 %v2104_v5  ;;  %v2051_v21 = vpop.f32.mrb[70].mxu1 }
0x1694   :  { %v3145_v22 = vpop.f32.mrb[71].mxu1 }
0x1697   :  { %2120 = vadd.xlane.f32.xlu0 %v2119_v23 }
0x1720   :  { %v2106_v24 = vpop.xlane.xlu0 %2105 }
0x1721   :  { %v2110_v25 = vsub.f32 %v2048_v20, %v2106_v24 }
0x1723   :  { %v2112_v26 = vmul.f32 1.442695, %v2110_v25 }
0x1724   :  { %v2121_v27 = vpop.xlane.xlu0 %2120 }
0x1725   :  { %3313 = vpow2.f32 %v2112_v26 }
0x1726   :  { %3315 = vrcp.f32 %v2121_v27 }
0x172f   :  { %v3314_v28 = vpop.eup %3313 }
0x1730   :  { %v3316_v29 = vpop.eup %3315  ;;  %v2116_v30 = vsel %vm202_vm2, %v3314_v28, 0.0 }
0x1731   :  { %v2125_v13 = vmul.f32 %v3316_v29, %v3312_v53  ;;  %2117 = vadd.xlane.f32.xlu0 %v2116_v30 }
0x1733   :  { %v2127_v59 = vpack.c.bf16 %v2125_v13, %v2125_v13 }
0x1735   :  { %3161 = vmatmul.mubr.msk.bf16.vlgmr.msra.gmra.mrb[68].mxu0 %vm202_vm2, %v2127_v59 }
0x1736   :  { %3171 = vmatpush3.bf16.xpose.msra.mxu0 %v2285_v32  ;;  %3172 = vmatprep.mubr.msk.bf16.mxu0 %vm3462_vm1, %v3461_v17 }
0x1737   :  { %3182 = vmatprep.subr.bf16.mxu0 %v3461_v17 }
0x173d   :  { %3173 = vmatmul.mubr.msk.bf16.vlgmr.msra.gmra.mrb[72].mxu0 %vm202_vm2, %v2278_v33 }
0x173e   :  { %3184 = vmatprep.mubr.msk.bf16.mxu0 %vm3462_vm1, %v3461_v17 }
0x1747   :  { %2128 = vrot.lane.b32.xlu0 %v3845_v47, %s3469_s17 }
0x174b   :  { %2329 = vrot.lane.b32.xlu0 %v3847_v48, %s3473_s22 }
0x174f   :  { %2327 = vrot.lane.b32.xlu0 %v3857_v3, %s3473_s22 }
0x17be   :  { %v2118_v34 = vpop.xlane.xlu0 %2117 }
0x17bf   :  { %3317 = vrcp.f32 %v2118_v34 }
0x17c2   :  { %v2129_v35 = vpop.permute.xlu0 %2128 }
0x17c3   :  { %v2134_v36 = vsel %vm327_vm4, %v2129_v35, 0 }
0x17c4   :  { %3153 = vmatpush3.bf16.msra.mxu1 %v2134_v36 }
0x17c5   :  { %3164 = vmatprep.subr.bf16.mxu1 %v3461_v17 }
0x17c6   :  { %v2330_v55 = vpop.permute.xlu0 %2329 }
0x17c7   :  { %v2335_v4 = vsel %vm202_vm2, %v2330_v55, 0 }
0x17c9   :  { %v3318_v37 = vpop.eup %3317 }
0x17ca   :  { %v2124_v38 = vmul.f32 %v3318_v37, %v3314_v28  ;;  %v2328_v7 = vpop.permute.xlu0 %2327 }
0x17cc   :  { %v2126_v40 = vpack.c.bf16 %v2124_v38, %v2124_v38 }
0x17ce   :  { %3155 = vmatmul.mubr.msk.bf16.vlgmr.msra.gmra.mrb[72].mxu1 %vm202_vm2, %v2126_v40 }
0x17cf   :  { %3165 = vmatpush3.bf16.msra.mxu1 %v2232_v39  ;;  %3166 = vmatprep.mubr.msk.bf16.mxu1 %vm3462_vm1, %v3461_v17 }
0x17d0   :  { %3176 = vmatprep.subr.bf16.mxu1 %v3461_v17 }
0x1808   :  { %v2218_v3 = vpop.f32.mrb[68].mxu0 }
0x1809   :  { %v3162_v46 = vpop.f32.mrb[69].mxu0 }
0x180a   :  { %v2221_v19 = vpop.f32.mrb[70].mxu0  ;;  %v2831_v46 = vld [vmem:[#allocation8 + $0x8] ss:$0 sm:$0xff] }
0x180b   :  { %v3163_v41 = vpop.f32.mrb[71].mxu0 }
0x1810   :  { %v2321_v42 = vpop.f32.mrb[72].mxu0 }
0x1811   :  { %v3174_v45 = vpop.f32.mrb[73].mxu0  ;;  %v2377_v44 = vsel %vm202_vm2, %v2321_v42, -inf }
0x1812   :  { %2378 = vmax.xlane.f32.xlu1 %v2377_v44  ;;  %v2324_v54 = vpop.f32.mrb[74].mxu0 }
0x1813   :  { %v3175_v49 = vpop.f32.mrb[75].mxu0 }
0x1823   :  { %2401 = vrot.lane.b32.xlu1 %v3845_v47, %s3472_s21 }
0x1827   :  { %2499 = vrot.lane.b32.xlu1 %v2829_v50, %s3468_s16 }
0x189f   :  { %v2379_v51 = vpop.xlane.xlu1 %2378 }
0x18a0   :  { %v2383_v52 = vsub.f32 %v2321_v42, %v2379_v51 }
0x18a1   :  { %v2170_v56 = vpop.f32.mrb[72].mxu1 }
0x18a2   :  { %v2224_v57 = vpack.c.bf16 %v2218_v3, %v2170_v56  ;;  %v3156_v58 = vpop.f32.mrb[73].mxu1  ;;  %v2385_v47 = vmul.f32 1.442695, %v2383_v52 }
0x18a3   :  { %v2402_v60 = vpop.permute.xlu1 %2401  ;;  %v2173_v63 = vpop.f32.mrb[74].mxu1 }
0x18a4   :  { %v2407_v0 = vsel %vm327_vm4, %v2402_v60, 0  ;;  %v3157_v8 = vpop.f32.mrb[75].mxu1  ;;  %3167 = vmatmul.mubr.msk.bf16.vlgmr.msra.gmra.mrb[76].mxu1 %vm202_vm2, %v2224_v57  ;;  %3319 = vpow2.f32 %v2385_v47  ;;  %v3251_v47 = vld [vmem:[#allocation7 + $0x20] sm:$0xff]  }
0x18a5   :  { %3177 = vmatpush3.bf16.xpose.msra.mxu1 %v2335_v4  ;;  %3183 = vmatpush3.bf16.msra.mxu0 %v2407_v0 }
0x18a6   :  { %3178 = vmatprep.mubr.msk.bf16.mxu1 %vm3462_vm1, %v3461_v17  ;;  %3188 = vmatprep.subr.bf16.mxu1 %v3461_v17 }
0x18a7   :  { %3194 = vmatprep.subr.bf16.mxu0 %v3461_v17  ;;  %v2500_v28 = vpop.permute.xlu1 %2499 }
0x18a8   :  { %v2505_v29 = vsel %vm327_vm4, %v2500_v28, 0 }
0x18ac   :  { %3179 = vmatmul.mubr.msk.bf16.vlgmr.msra.gmra.mrb[80].mxu1 %vm202_vm2, %v2328_v7 }
0x18ad   :  { %3190 = vmatprep.mubr.msk.bf16.mxu1 %vm3462_vm1, %v3461_v17 }
0x18ae   :  { %v3320_v61 = vpop.eup %3319 }
0x18af   :  { %v2389_v21 = vsel %vm202_vm2, %v3320_v61, 0.0 }
0x1977   :  { %v2268_v43 = vpop.f32.mrb[76].mxu1 }
0x1978   :  { %v2275_v15 = vadd.f32 %v2268_v43, %v3976_v18  ;;  %v3168_v9 = vpop.f32.mrb[77].mxu1  ;;  %v3252_v43 = vld [vmem:[#allocation7 + $0x28] sm:$0xff]  }
0x1979   :  { %v2271_v1 = vpop.f32.mrb[78].mxu1 }
0x197a   :  { %v2276_v10 = vadd.f32 %v2271_v1, %v3978_v14  ;;  %v3169_v12 = vpop.f32.mrb[79].mxu1 }
0x197f   :  { %v2371_v6 = vpop.f32.mrb[80].mxu1 }
0x1980   :  { %v3180_v16 = vpop.f32.mrb[81].mxu1  ;;  %v2380_v20 = vsel %vm202_vm2, %v2371_v6, -inf }
0x1981   :  { %2381 = vmax.xlane.f32.xlu0 %v2380_v20  ;;  %v2374_v5 = vpop.f32.mrb[82].mxu1  ;;  %v2832_v20 = vld [vmem:[#allocation8 + $0x9] ss:$0 sm:$0xff] }
0x1982   :  { %v3181_v53 = vpop.f32.mrb[83].mxu1 }
0x1985   :  { %2390 = vadd.xlane.f32.xlu0 %v2389_v21 }
0x1a0e   :  { %v2382_v22 = vpop.xlane.xlu0 %2381 }
0x1a0f   :  { %v2384_v23 = vsub.f32 %v2371_v6, %v2382_v22  ;;  %v2833_v22 = vld [vmem:[#allocation8 + $0xa] ss:$0 sm:$0xff] }
0x1a11   :  { %v2387_v24 = vmul.f32 1.442695, %v2384_v23 }
0x1a12   :  { %v2391_v18 = vpop.xlane.xlu0 %2390 }
0x1a13   :  { %3321 = vpow2.f32 %v2387_v24 }
0x1a14   :  { %3323 = vrcp.f32 %v2391_v18 }
0x1a1d   :  { %v3322_v25 = vpop.eup %3321 }
0x1a1e   :  { %v3324_v14 = vpop.eup %3323  ;;  %v2392_v26 = vsel %vm202_vm2, %v3322_v25, 0.0 }
0x1a1f   :  { %v2397_v27 = vmul.f32 %v3324_v14, %v3320_v61  ;;  %2393 = vadd.xlane.f32.xlu0 %v2392_v26  ;;  %v3253_v14 = vld [vmem:[#allocation7 + $0x30] sm:$0xff]   ;;  %v3254_v26 = vld [vmem:[#allocation7 + $0x38] sm:$0xff]  }
0x1a21   :  { %v2399_v11 = vpack.c.bf16 %v2397_v27, %v2397_v27  ;;  %v2834_v27 = vld [vmem:[#allocation8 + $0xb] ss:$0 sm:$0xff] }
0x1a23   :  { %3185 = vmatmul.mubr.msk.bf16.vlgmr.msra.gmra.mrb[76].mxu0 %vm202_vm2, %v2399_v11 }
0x1a24   :  { %3196 = vmatprep.mubr.msk.bf16.mxu0 %vm3462_vm1, %v3461_v17  ;;  %3195 = vmatpush3.bf16.msra.mxu0 %v2505_v29 }
0x1a25   :  { %3208 = vmatprep.subr.bf16.mxu0 %v3461_v17 }
0x1a35   :  { %2449 = vrot.lane.b32.xlu0 %v3847_v48, %s3472_s21 }
0x1aac   :  { %v2394_v30 = vpop.xlane.xlu0 %2393 }
0x1aad   :  { %3325 = vrcp.f32 %v2394_v30 }
0x1ab0   :  { %v2450_v13 = vpop.permute.xlu0 %2449 }
0x1ab1   :  { %v2455_v31 = vsel %vm327_vm4, %v2450_v13, 0 }
0x1ab2   :  { %3189 = vmatpush3.bf16.msra.mxu1 %v2455_v31 }
0x1ab3   :  { %3200 = vmatprep.subr.bf16.mxu1 %v3461_v17 }
0x1ab7   :  { %v3326_v59 = vpop.eup %3325 }
0x1ab8   :  { %v2398_v32 = vmul.f32 %v3326_v59, %v3322_v25 }
0x1aba   :  { %v2400_v33 = vpack.c.bf16 %v2398_v32, %v2398_v32 }
0x1abc   :  { %3191 = vmatmul.mubr.msk.bf16.vlgmr.msra.gmra.mrb[84].mxu1 %vm202_vm2, %v2400_v33 }
0x1abd   :  { %3204 = vmatprep.mubr.msk.bf16.mxu1 %vm3462_vm1, %v3461_v17  ;;  %3201 = vmatpush3.bf16.msra.mxu1 %v3251_v47 }
0x1abe   :  { %3202 = vmatprep.subr.bf16.mxu1 %v3461_v17 }
0x1ac1   :  { %3203 = vmatpush3.bf16.msra.mxu1 %v3252_v43 }
0x1af6   :  { %v2443_v48 = vpop.f32.mrb[76].mxu0 }
0x1af7   :  { %v3186_v34 = vpop.f32.mrb[77].mxu0 }
0x1af8   :  { %v2446_v35 = vpop.f32.mrb[78].mxu0 }
0x1af9   :  { %v3187_v36 = vpop.f32.mrb[79].mxu0 }
0x1b8f   :  { %v2491_v37 = vpop.f32.mrb[84].mxu1 }
0x1b90   :  { %v2497_v38 = vpack.c.bf16 %v2491_v37, %v2443_v48  ;;  %v3192_v39 = vpop.f32.mrb[85].mxu1 }
0x1b91   :  { %v2494_v40 = vpop.f32.mrb[86].mxu1 }
0x1b92   :  { %v3193_v3 = vpop.f32.mrb[87].mxu1  ;;  %3197 = vmatmul.mubr.msk.bf16.vlgmr.msra.gmra.mrb[80].mxu0 %vm202_vm2, %v2497_v38 }
0x1b93   :  { %3212 = vmatprep.mubr.msk.bf16.mxu0 %vm3462_vm1, %v3461_v17  ;;  %3209 = vmatpush3.bf16.xpose.msra.mxu0 %v3253_v14 }
0x1b94   :  { %3210 = vmatprep.subr.bf16.mxu0 %v3461_v17 }
0x1b9b   :  { %3211 = vmatpush3.bf16.xpose.msra.mxu0 %v3254_v26 }
0x1c65   :  { %v2541_v19 = vpop.f32.mrb[80].mxu0 }
0x1c66   :  { %v2548_v41 = vadd.f32 %v2541_v19, %v2275_v15  ;;  %v3198_v42 = vpop.f32.mrb[81].mxu0 }
0x1c67   :  { %v2544_v45 = vpop.f32.mrb[82].mxu0 }
0x1c68   :  { %v2554_v44 = vadd.f32 %v2831_v46, %v2548_v41  ;;  %v2549_v54 = vadd.f32 %v2544_v45, %v2276_v10  ;;  %v3199_v49 = vpop.f32.mrb[83].mxu0 }
0x1c6a   :  { %v4041_v50 = vadd.f32 %v2554_v44, %v3808_v62  ;;  %v2555_v51 = vadd.f32 %v2831_v46, %v2549_v54  ;;  %v2838_v54 = vld [vmem:[#allocation8 + $0xc] ss:$0 sm:$0xff] }
0x1c6c   :  { %v4044_v52 = vadd.f32 %v2555_v51, %v3811_v2  ;;  %v2560_v55 = vsel %vm86_vm0, %v4041_v50, 0.0 }
0x1c6d   :  { %2561 = vadd.xlane.f32.xlu1 %v2560_v55 }
0x1c6e   :  { %v2563_v56 = vsel %vm86_vm0, %v4044_v52, 0.0 }
0x1c6f   :  { %2564 = vadd.xlane.f32.xlu0 %v2563_v56 }
0x1cfa   :  { %v2562_v57 = vpop.xlane.xlu1 %2561 }
0x1cfb   :  { %v2566_v58 = vmul.f32 0.03125, %v2562_v57 }
0x1cfc   :  { %v2565_v60 = vpop.xlane.xlu0 %2564 }
0x1cfd   :  { %v2568_v63 = vsub.f32 %v4041_v50, %v2566_v58  ;;  %v2567_v4 = vmul.f32 0.03125, %v2565_v60 }
0x1cff   :  { %v2569_v62 = vsub.f32 %v4044_v52, %v2567_v4  ;;  %v2570_v0 = vmul.f32 %v2568_v63, %v2568_v63 }
0x1d01   :  { %v2572_v2 = vsel %vm86_vm0, %v2570_v0, 0.0  ;;  %v2571_v8 = vmul.f32 %v2569_v62, %v2569_v62 }
0x1d02   :  { %2573 = vadd.xlane.f32.xlu0 %v2572_v2 }
0x1d03   :  { %v2575_v7 = vsel %vm86_vm0, %v2571_v8, 0.0 }
0x1d04   :  { %2576 = vadd.xlane.f32.xlu1 %v2575_v7 }
0x1d8f   :  { %v2574_v15 = vpop.xlane.xlu0 %2573 }
0x1d90   :  { %v2578_v9 = vmul.f32 0.03125, %v2574_v15 }
0x1d91   :  { %v2577_v1 = vpop.xlane.xlu1 %2576 }
0x1d92   :  { %v2580_v10 = vadd.f32 1e-05, %v2578_v9  ;;  %v2579_v12 = vmul.f32 0.03125, %v2577_v1 }
0x1d94   :  { %3327 = vrsqrt.f32 %v2580_v10  ;;  %v2581_v6 = vadd.f32 1e-05, %v2579_v12 }
0x1d96   :  { %3329 = vrsqrt.f32 %v2581_v6 }
0x1d9e   :  { %v3328_v16 = vpop.eup %3327 }
0x1d9f   :  { %v2584_v61 = vmul.f32 %v3328_v16, %v2568_v63 }
0x1da0   :  { %v3330_v5 = vpop.eup %3329 }
0x1da1   :  { %v2590_v53 = vmul.f32 %v2832_v20, %v2584_v61  ;;  %v2585_v21 = vmul.f32 %v3330_v5, %v2569_v62 }
0x1da3   :  { %v2591_v23 = vmul.f32 %v2832_v20, %v2585_v21  ;;  %v2596_v24 = vadd.f32 %v2833_v22, %v2590_v53 }
0x1da5   :  { %v2597_v18 = vadd.f32 %v2833_v22, %v2591_v23 }
0x1da7   :  { %v2603_v25 = vpack.c.bf16 %v2597_v18, %v2596_v24 }
0x1da9   :  { %3205 = vmatmul.mubr.msk.bf16.vlgmr.msra.gmra.mrb[88].mxu1 %vm86_vm0, %v2603_v25 }
0x1e7c   :  { %v2657_v11 = vpop.f32.mrb[88].mxu1 }
0x1e7d   :  { %v2658_v28 = vadd.f32 %v2834_v27, %v2657_v11  ;;  %v3206_v29 = vpop.f32.mrb[89].mxu1 }
0x1e7e   :  { %v2660_v30 = vpop.f32.mrb[90].mxu1 }
0x1e7f   :  { %v2668_v13 = vmul.f32 0.044715, %v2658_v28  ;;  %v2661_v31 = vadd.f32 %v2834_v27, %v2660_v30  ;;  %v3207_v59 = vpop.f32.mrb[91].mxu1  ;;  %v2666_v48 = vmul.f32 0.7978846, %v2658_v28  ;;  %v2664_v46 = vmul.f32 0.5, %v2658_v28 }
0x1e81   :  { %v2670_v32 = vmul.f32 %v2668_v13, %v2658_v28  ;;  %v2669_v33 = vmul.f32 0.044715, %v2661_v31  ;;  %v2667_v37 = vmul.f32 0.7978846, %v2661_v31  ;;  %v2665_v19 = vmul.f32 0.5, %v2661_v31 }
0x1e83   :  { %v2672_v34 = vadd.f32 1.0, %v2670_v32  ;;  %v2671_v35 = vmul.f32 %v2669_v33, %v2661_v31 }
0x1e85   :  { %v2674_v36 = vmul.f32 %v2672_v34, %v2666_v48  ;;  %v2673_v38 = vadd.f32 1.0, %v2671_v35 }
0x1e87   :  { %3331 = vtanh.f32 %v2674_v36  ;;  %v2675_v17 = vmul.f32 %v2673_v38, %v2667_v37 }
0x1e89   :  { %3333 = vtanh.f32 %v2675_v17 }
0x1e91   :  { %v3332_v39 = vpop.eup %3331 }
0x1e92   :  { %v2678_v40 = vadd.f32 1.0, %v3332_v39 }
0x1e93   :  { %v3334_v3 = vpop.eup %3333 }
0x1e94   :  { %v2679_v41 = vadd.f32 1.0, %v3334_v3  ;;  %v2680_v42 = vmul.f32 %v2678_v40, %v2664_v46 }
0x1e96   :  { %v2681_v45 = vmul.f32 %v2679_v41, %v2665_v19 }
0x1e98   :  { %v2686_v44 = vpack.c.bf16 %v2681_v45, %v2680_v42 }
0x1e9a   :  { %3213 = vmatmul.mubr.bf16.vlgmr.msra.gmra.mrb[84].mxu0 %v2686_v44 }
0x1f6d   :  { %v2738_v49 = vpop.f32.mrb[84].mxu0 }
0x1f6e   :  { %v2739_v51 = vadd.f32 %v2838_v54, %v2738_v49  ;;  %v3214_v55 = vpop.f32.mrb[85].mxu0 }
0x1f6f   :  { %v2741_v56 = vpop.f32.mrb[86].mxu0 }
0x1f70   :  { %v2745_v57 = vadd.f32 %v2739_v51, %v4041_v50  ;;  %v2742_v58 = vadd.f32 %v2838_v54, %v2741_v56  ;;  %v3215_v60 = vpop.f32.mrb[87].mxu0 }
0x1f72   :  { %2747 = vst.msk [vmem:[#allocation10] sm:$0xff] %vm86_vm0, %v2745_v57  ;;  %v2746_v63 = vadd.f32 %v2742_v58, %v4044_v52 }
0x1f74   :  { %2748 = vst.msk [vmem:[#allocation10 + $0x8] sm:$0xff] %vm86_vm0, %v2746_v63 }
0x1f75   :  { %3434 = shalt.err (!%p3431_p8)
}
0x1f76   :  { %s3435_s29 = scalar_lea.hbm %s4080_s4, 256 }
0x1f77   :  { %p3436_p9 = scmp.ne.s32.totalorder %s4080_s4, %s3435_s29  ;;  %p3439_p10 = scmp.lt.u32.totalorder %s3435_s29, %s4080_s4 }
0x1f79   :  { %p3441_p11 = pnand %p3439_p10, %p3436_p9 }
0x1f7b   :  { %3444 = shalt.err (!%p3441_p11)
}
0x1f7c   :  { %2760 = dma.vmem_to_hbm [thread:$0]  %s2755_s0, 256, %s4080_s4, [#allocation4], %s3455_s27, %s3455_s27, %s3456_s28  }
0x1f7d   :  { %3451 = dma.done.wait [#allocation4], 256  }
0x1f7e   :  { %3452 = vsyncadd [#allocation4], 4294967040 }
0x1f7f   :  { %2764 = vsyncpa [#allocation3], 1 }
0x1f80   :  { %2765 = vsyncpa [#allocation6], 1 }
0x1f81   :  { %2766 = vsyncpa [#allocation9], 1 }
0x1f82   :  { %2767 = vsyncpa [#allocation4], 1 }

</bundles_post_ra>
